<compile_context>
chip_gen: v7x
topology: tpu7x:2x2x1
jax: 0.10.0
libtpu: 0.0.40
codegen_flags: <defaults>
</compile_context>

<pallas_src>
import functools

import jax
import jax.numpy as jnp
from jax import lax
from jax.experimental import pallas as pl
from jax.experimental.pallas import tpu as pltpu


def _round_up(x, m):
    return (x + m - 1) // m * m


def mlp_kernel(x_ref, w1_ref, b1_ref, w2_ref, b2_ref, w3_ref, b3_ref, o_ref,
               *, chunk, steps):
    """Fused MLP over one batch tile.

    x_ref:  (TB, F)  bf16     o_ref:  (TB, 1)  f32
    w1_ref: (F, 50)  bf16     b1_ref: (1, 50)  f32
    w2_ref: (50, 25) bf16     b2_ref: (1, 25)  f32
    w3_ref: (1, 25)  f32      b3_ref: (1, 1)   f32
    """
    # Hoist weight/bias loads out of the inner chunk loop (no re-broadcast per iter).
    w1 = w1_ref[...]
    w2 = w2_ref[...]
    b1 = b1_ref[...]
    b2 = b2_ref[...]
    w3 = w3_ref[...]
    b3 = b3_ref[...]

    def body(c, carry):
        start = pl.multiple_of(c * chunk, chunk)
        rows = pl.ds(start, chunk)
        xc = x_ref[rows, :]                                    # (chunk, F) bf16

        # Layer 1: bf16 MXU matmul, f32 accumulate; bias + ReLU on the VPU in f32.
        h1 = jnp.dot(xc, w1, preferred_element_type=jnp.float32)
        h1 = jnp.maximum(h1 + b1, 0.0)

        # Layer 2.
        h2 = jnp.dot(h1.astype(jnp.bfloat16), w2,
                     preferred_element_type=jnp.float32)
        h2 = jnp.maximum(h2 + b2, 0.0)

        # Layer 3 (out_features=1): VPU multiply + XLU lane-reduce; keeps the MXU free.
        out = jnp.sum(h2 * w3, axis=-1, keepdims=True) + b3    # (chunk, 1) f32
        o_ref[rows, :] = out.astype(o_ref.dtype)
        return carry

    # Unrolled so the scheduler sees the whole body; chunking bounds live ranges.
    lax.fori_loop(0, steps, body, 0, unroll=True)


def pytorch_mlp_forward(x, params, *, chunk=512, max_tile=8192):
    """x: (B, F) float32. params: dict w1,b1,w2,b2,w3,b3 (f32 master copies).
    Returns (B,) logits, matching PyTorchMLP.forward (incl. the .flatten())."""
    B, F = x.shape

    # bf16 operands for the MXU / HBM stream; biases and accumulation stay f32.
    w1 = params["w1"].astype(jnp.bfloat16)                    # (F, 50)
    w2 = params["w2"].astype(jnp.bfloat16)                    # (50, 25)
    b1 = params["b1"].astype(jnp.float32)                     # (1, 50)
    b2 = params["b2"].astype(jnp.float32)                     # (1, 25)
    w3 = params["w3"].reshape(1, -1).astype(jnp.float32)      # (1, 25) row layout
    b3 = params["b3"].reshape(1, 1).astype(jnp.float32)       # (1, 1)

    # Batch tile: big DMA block (amortizes ~0.35us/grid-step), capped so the
    # double-buffered x tiles stay comfortably inside scoped VMEM on all chips.
    tile = min(max_tile, _round_up(B, chunk))
    vmem_cap_rows = max(chunk, ((2 * 1024 * 1024) // (F * 2)) // chunk * chunk)
    tile = min(tile, vmem_cap_rows)
    b_pad = _round_up(B, tile)

    x_in = x.astype(jnp.bfloat16)
    if b_pad != B:
        x_in = jnp.pad(x_in, ((0, b_pad - B), (0, 0)))

    grid = b_pad // tile
    steps = tile // chunk
    kernel = functools.partial(mlp_kernel, chunk=chunk, steps=steps)

    out = pl.pallas_call(
        kernel,
        out_shape=jax.ShapeDtypeStruct((b_pad, 1), jnp.float32),
        grid_spec=pltpu.PrefetchScalarGridSpec(
            num_scalar_prefetch=0,
            grid=(grid,),
            in_specs=[
                pl.BlockSpec((tile, F), lambda i: (i, 0)),    # x: streamed per tile
                pl.BlockSpec(w1.shape, lambda i: (0, 0)),     # weights/biases resident
                pl.BlockSpec(b1.shape, lambda i: (0, 0)),
                pl.BlockSpec(w2.shape, lambda i: (0, 0)),
                pl.BlockSpec(b2.shape, lambda i: (0, 0)),
                pl.BlockSpec(w3.shape, lambda i: (0, 0)),
                pl.BlockSpec(b3.shape, lambda i: (0, 0)),
            ],
            out_specs=pl.BlockSpec((tile, 1), lambda i: (i, 0)),
        ),
        compiler_params=pltpu.CompilerParams(
            dimension_semantics=("parallel",),   # batch tiles shard across TCs on v7x
            vmem_limit_bytes=48 * 1024 * 1024,
        ),
    )(x_in, w1, b1, w2, b2, w3, b3)

    # .flatten() from the PyTorch forward, dropping batch padding.
    return out.reshape(-1)[:B]


def init_params(key, num_features):
    """Deterministic init mimicking PyTorch Linear (uniform(-1/sqrt(fan_in), +))."""
    dims = [(num_features, 50), (50, 25), (25, 1)]
    params = {}
    keys = jax.random.split(key, 2 * len(dims))
    for idx, (fan_in, fan_out) in enumerate(dims):
        bound = 1.0 / jnp.sqrt(jnp.float32(fan_in))
        params[f"w{idx + 1}"] = jax.random.uniform(
            keys[2 * idx], (fan_in, fan_out), jnp.float32, -bound, bound)
        params[f"b{idx + 1}"] = jax.random.uniform(
            keys[2 * idx + 1], (1, fan_out), jnp.float32, -bound, bound)
    return params


if __name__ == "__main__":
    key = jax.random.PRNGKey(0)
    k_x, k_p = jax.random.split(key)

    batch = 8
    num_features = 32
    x = jax.random.normal(k_x, (batch, num_features), jnp.float32)
    params = init_params(k_p, num_features)

    logits = pytorch_mlp_forward(x, params)
    jax.block_until_ready(logits)

    # Reference in plain JAX, matching the kernel's bf16 operand rounding.
    xb = x.astype(jnp.bfloat16).astype(jnp.float32)
    w1b = params["w1"].astype(jnp.bfloat16).astype(jnp.float32)
    w2b = params["w2"].astype(jnp.bfloat16).astype(jnp.float32)
    h = jnp.maximum(xb @ w1b + params["b1"], 0.0)
    h = h.astype(jnp.bfloat16).astype(jnp.float32)
    h = jnp.maximum(h @ w2b + params["b2"], 0.0)
    ref = (h @ params["w3"] + params["b3"]).reshape(-1)

    assert logits.shape == (batch,)
    assert jnp.allclose(logits, ref, atol=2e-3, rtol=2e-3), float(
        jnp.max(jnp.abs(logits - ref)))

    print("KERNEL_OK")
</pallas_src>

<mosaic_0001>
module attributes {stable_mosaic.version = 11 : i64} {
  func.func @mlp_kernel(%arg0: i32, %arg1: memref<512x32xbf16, #tpu.memory_space<vmem>>, %arg2: memref<32x50xbf16, #tpu.memory_space<vmem>>, %arg3: memref<1x50xf32, #tpu.memory_space<vmem>>, %arg4: memref<50x25xbf16, #tpu.memory_space<vmem>>, %arg5: memref<1x25xf32, #tpu.memory_space<vmem>>, %arg6: memref<1x25xf32, #tpu.memory_space<vmem>>, %arg7: memref<1x1xf32, #tpu.memory_space<vmem>>, %arg8: memref<512x1xf32, #tpu.memory_space<vmem>>) attributes {dimension_semantics = [#tpu.dimension_semantics<parallel>], iteration_bounds = array<i64: 1>, scalar_prefetch = 0 : i64, scratch_operands = 0 : i64, tpu.core_type = #tpu.core_type<tc>, window_params = [{transform_indices = @transform_0, window_bounds = array<i64: 512, 32>}, {pipeline_mode = #tpu.pipeline_mode<synchronous>, transform_indices = @transform_1, window_bounds = array<i64: 32, 50>}, {pipeline_mode = #tpu.pipeline_mode<synchronous>, transform_indices = @transform_2, window_bounds = array<i64: 1, 50>}, {pipeline_mode = #tpu.pipeline_mode<synchronous>, transform_indices = @transform_3, window_bounds = array<i64: 50, 25>}, {pipeline_mode = #tpu.pipeline_mode<synchronous>, transform_indices = @transform_4, window_bounds = array<i64: 1, 25>}, {pipeline_mode = #tpu.pipeline_mode<synchronous>, transform_indices = @transform_5, window_bounds = array<i64: 1, 25>}, {pipeline_mode = #tpu.pipeline_mode<synchronous>, transform_indices = @transform_6, window_bounds = array<i64: 1, 1>}, {transform_indices = @transform_7, window_bounds = array<i64: 512, 1>}]} {
    %c0 = arith.constant 0 : index
    %c0_0 = arith.constant 0 : index
    %0 = vector.load %arg2[%c0, %c0_0] : memref<32x50xbf16, #tpu.memory_space<vmem>>, vector<32x50xbf16>
    %c0_1 = arith.constant 0 : index
    %c0_2 = arith.constant 0 : index
    %1 = vector.load %arg4[%c0_1, %c0_2] : memref<50x25xbf16, #tpu.memory_space<vmem>>, vector<50x25xbf16>
    %c0_3 = arith.constant 0 : index
    %c0_4 = arith.constant 0 : index
    %2 = vector.load %arg3[%c0_3, %c0_4] : memref<1x50xf32, #tpu.memory_space<vmem>>, vector<1x50xf32>
    %c0_5 = arith.constant 0 : index
    %c0_6 = arith.constant 0 : index
    %3 = vector.load %arg5[%c0_5, %c0_6] : memref<1x25xf32, #tpu.memory_space<vmem>>, vector<1x25xf32>
    %c0_7 = arith.constant 0 : index
    %c0_8 = arith.constant 0 : index
    %4 = vector.load %arg6[%c0_7, %c0_8] : memref<1x25xf32, #tpu.memory_space<vmem>>, vector<1x25xf32>
    %c0_9 = arith.constant 0 : index
    %c0_10 = arith.constant 0 : index
    %5 = vector.load %arg7[%c0_9, %c0_10] : memref<1x1xf32, #tpu.memory_space<vmem>>, vector<1x1xf32>
    %c0_i32 = arith.constant 0 : i32
    %c512_i32 = arith.constant 512 : i32
    %6 = arith.muli %c0_i32, %c512_i32 : i32
    %7 = tpu.assume_multiple %6, 512 : i32
    %8 = arith.index_cast %7 : i32 to index
    %c0_11 = arith.constant 0 : index
    %9 = vector.load %arg1[%8, %c0_11] : memref<512x32xbf16, #tpu.memory_space<vmem>>, vector<512x32xbf16>
    %cst = arith.constant dense<0.000000e+00> : vector<512x50xf32>
    %10 = tpu.matmul %9, %0, %cst {dimension_numbers = #tpu.dot_dimension_numbers<[1], [0], [0], [1], [0, 0, 1, 1], [], []>} : vector<512x32xbf16>, vector<32x50xbf16>, vector<512x50xf32> -> vector<512x50xf32>
    %11 = vector.broadcast %2 : vector<1x50xf32> to vector<512x50xf32>
    %12 = arith.addf %10, %11 : vector<512x50xf32>
    %cst_12 = arith.constant 0.000000e+00 : f32
    %13 = vector.broadcast %cst_12 : f32 to vector<512x50xf32>
    %14 = arith.maximumf %12, %13 : vector<512x50xf32>
    %15 = arith.truncf %14 : vector<512x50xf32> to vector<512x50xbf16>
    %cst_13 = arith.constant dense<0.000000e+00> : vector<512x25xf32>
    %16 = tpu.matmul %15, %1, %cst_13 {dimension_numbers = #tpu.dot_dimension_numbers<[1], [0], [0], [1], [0, 0, 1, 1], [], []>} : vector<512x50xbf16>, vector<50x25xbf16>, vector<512x25xf32> -> vector<512x25xf32>
    %17 = vector.broadcast %3 : vector<1x25xf32> to vector<512x25xf32>
    %18 = arith.addf %16, %17 : vector<512x25xf32>
    %cst_14 = arith.constant 0.000000e+00 : f32
    %19 = vector.broadcast %cst_14 : f32 to vector<512x25xf32>
    %20 = arith.maximumf %18, %19 : vector<512x25xf32>
    %21 = vector.broadcast %4 : vector<1x25xf32> to vector<512x25xf32>
    %22 = arith.mulf %20, %21 : vector<512x25xf32>
    %cst_15 = arith.constant dense<0.000000e+00> : vector<512xf32>
    %23 = vector.multi_reduction <add>, %22, %cst_15 [1] : vector<512x25xf32> to vector<512xf32>
    %24 = vector.shape_cast %23 : vector<512xf32> to vector<512x1xf32>
    %25 = vector.broadcast %5 : vector<1x1xf32> to vector<512x1xf32>
    %26 = arith.addf %24, %25 : vector<512x1xf32>
    %27 = arith.index_cast %7 : i32 to index
    %c0_16 = arith.constant 0 : index
    %28 = vector.load %arg8[%27, %c0_16] : memref<512x1xf32, #tpu.memory_space<vmem>>, vector<512x1xf32>
    tpu.vector_store %arg8[%27, %c0_16], %26 {strides = array<i32>} : memref<512x1xf32, #tpu.memory_space<vmem>>, vector<512x1xf32>,
    %c1_i32 = arith.constant 1 : i32
    return
  }
  func.func @transform_0(%arg0: i32) -> (i32, i32) {
    %c0_i32 = arith.constant 0 : i32
    %c0_i32_0 = arith.constant 0 : i32
    return %arg0, %c0_i32 : i32, i32
  }
  func.func @transform_1(%arg0: i32) -> (i32, i32) {
    %c0_i32 = arith.constant 0 : i32
    %c0_i32_0 = arith.constant 0 : i32
    %c0_i32_1 = arith.constant 0 : i32
    return %c0_i32, %c0_i32_0 : i32, i32
  }
  func.func @transform_2(%arg0: i32) -> (i32, i32) {
    %c0_i32 = arith.constant 0 : i32
    %c0_i32_0 = arith.constant 0 : i32
    %c0_i32_1 = arith.constant 0 : i32
    return %c0_i32, %c0_i32_0 : i32, i32
  }
  func.func @transform_3(%arg0: i32) -> (i32, i32) {
    %c0_i32 = arith.constant 0 : i32
    %c0_i32_0 = arith.constant 0 : i32
    %c0_i32_1 = arith.constant 0 : i32
    return %c0_i32, %c0_i32_0 : i32, i32
  }
  func.func @transform_4(%arg0: i32) -> (i32, i32) {
    %c0_i32 = arith.constant 0 : i32
    %c0_i32_0 = arith.constant 0 : i32
    %c0_i32_1 = arith.constant 0 : i32
    return %c0_i32, %c0_i32_0 : i32, i32
  }
  func.func @transform_5(%arg0: i32) -> (i32, i32) {
    %c0_i32 = arith.constant 0 : i32
    %c0_i32_0 = arith.constant 0 : i32
    %c0_i32_1 = arith.constant 0 : i32
    return %c0_i32, %c0_i32_0 : i32, i32
  }
  func.func @transform_6(%arg0: i32) -> (i32, i32) {
    %c0_i32 = arith.constant 0 : i32
    %c0_i32_0 = arith.constant 0 : i32
    %c0_i32_1 = arith.constant 0 : i32
    return %c0_i32, %c0_i32_0 : i32, i32
  }
  func.func @transform_7(%arg0: i32) -> (i32, i32) {
    %c0_i32 = arith.constant 0 : i32
    %c0_i32_0 = arith.constant 0 : i32
    return %arg0, %c0_i32 : i32, i32
  }
}

</mosaic_0001>

<bundles_post_ra>
// kernel: tpu_custom_call.1
= control target key start
LH: loop header
LB: loop body
LE: loop exit
PB: predicated region body
PF: predicated region fallthrough
CT: control target
= control target key end

     0   :  { %vm286_vm0 = vcmask 261120   ;;  %vm892_vm1 = vcmask 1040384   ;;  %vm795_vm2 = vcmask 408576   ;;  %vm1319_vm3 = vcmask 203776   ;;  %s2820_s1 = inlined_call_operand.vmem [shape: bf16[32,50], index: 1, kind: input, shape index: {}]   ;;  %s2821_s0 = inlined_call_operand.vmem [shape: bf16[512,32], index: 0, kind: input, shape index: {}]   ;;  %s2822_s3 = inlined_call_operand.vmem [shape: bf16[50,25], index: 3, kind: input, shape index: {}]   ;;  %s2823_s2 = inlined_call_operand.vmem [shape: f32[1,50], index: 2, kind: input, shape index: {}]   ;;  %s2824_s4 = inlined_call_operand.vmem [shape: f32[1,25], index: 4, kind: input, shape index: {}]   ;;  %s2825_s5 = inlined_call_operand.vmem [shape: f32[1,25], index: 5, kind: input, shape index: {}]   ;;  %s2826_s6 = inlined_call_operand.<no memory space> [shape: f32[1,1], index: 6, kind: input, shape index: {}]   ;;  %s2827_s7 = inlined_call_operand.vmem [shape: f32[512,1], index: 7, kind: output, shape index: {}]  }
   0x1   :  { %v1968_v0 = vld [vmem:[%s2820_s1] sm:$0xff]   ;;  %v1969_v1 = vld [vmem:[%s2820_s1 + $0x8] sm:$0xff]   ;;  %v1972_v4 = vld [vmem:[%s2821_s0 + $0x10] sm:$0xff]   ;;  %vm1582_vm4 = vcmask 7168  }
   0x2   :  { %1827 = vmatprep.subr.bf16.mxu0 %v1968_v0  ;;  %v1970_v2 = vld [vmem:[%s2821_s0] sm:$0xff]   ;;  %v1971_v3 = vld [vmem:[%s2821_s0 + $0x8] sm:$0xff]   ;;  %v1973_v5 = vld [vmem:[%s2821_s0 + $0x18] sm:$0xff]  }
   0x3   :  { %1828 = vmatpush3.bf16.msra.mxu0 %v1968_v0  ;;  %1831 = vmatprep.mubr.msk.bf16.mxu0 %vm286_vm0, %v1970_v2  ;;  %v1974_v6 = vld [vmem:[%s2821_s0 + $0x20] sm:$0xff]   ;;  %v1975_v7 = vld [vmem:[%s2821_s0 + $0x28] sm:$0xff]   ;;  %v1976_v8 = vld [vmem:[%s2821_s0 + $0x30] sm:$0xff]  }
   0x4   :  { %1829 = vmatprep.subr.bf16.mxu0 %v1969_v1  ;;  %v1977_v9 = vld [vmem:[%s2821_s0 + $0x38] sm:$0xff]   ;;  %v1978_v10 = vld [vmem:[%s2821_s0 + $0x40] sm:$0xff]   ;;  %v2003_v12 = vld [vmem:[%s2822_s3 + $0x8] sm:$0xff]  }
   0x5   :  { %v2002_v11 = vld [vmem:[%s2822_s3] sm:$0xff]   ;;  %v1979_v13 = vld [vmem:[%s2821_s0 + $0x48] sm:$0xff]   ;;  %v1980_v14 = vld [vmem:[%s2821_s0 + $0x50] sm:$0xff]  }
   0x6   :  { %1895 = vmatprep.subr.bf16.mxu1 %v2002_v11  ;;  %v1981_v15 = vld [vmem:[%s2821_s0 + $0x58] sm:$0xff]   ;;  %v1982_v16 = vld [vmem:[%s2821_s0 + $0x60] sm:$0xff]   ;;  %v1983_v17 = vld [vmem:[%s2821_s0 + $0x68] sm:$0xff]  }
   0x7   :  { %1830 = vmatpush3.bf16.msra.mxu0 %v1969_v1  ;;  %1896 = vmatpush3.bf16.msra.mxu1 %v2002_v11  ;;  %v1984_v18 = vld [vmem:[%s2821_s0 + $0x70] sm:$0xff]   ;;  %v1985_v19 = vld [vmem:[%s2821_s0 + $0x78] sm:$0xff]   ;;  %v1986_v20 = vld [vmem:[%s2821_s0 + $0x80] sm:$0xff]  }
   0x8   :  { %1897 = vmatprep.subr.bf16.mxu1 %v2003_v12  ;;  %v1987_v21 = vld [vmem:[%s2821_s0 + $0x88] sm:$0xff]   ;;  %v1988_v22 = vld [vmem:[%s2821_s0 + $0x90] sm:$0xff]   ;;  %v1989_v23 = vld [vmem:[%s2821_s0 + $0x98] sm:$0xff]  }
   0x9   :  { %v1990_v24 = vld [vmem:[%s2821_s0 + $0xa0] sm:$0xff]   ;;  %v1991_v25 = vld [vmem:[%s2821_s0 + $0xa8] sm:$0xff]   ;;  %v1992_v26 = vld [vmem:[%s2821_s0 + $0xb0] sm:$0xff]  }
   0xa   :  { %1832 = vmatmul.mubr.msk.bf16.vlgmr.msra.gmra.mrb[0].mxu0 %vm286_vm0, %v1971_v3  ;;  %v1993_v27 = vld [vmem:[%s2821_s0 + $0xb8] sm:$0xff]   ;;  %v2004_v28 = vld [vmem:[%s2822_s3 + $0x10] sm:$0xff]   ;;  %v1994_v29 = vld [vmem:[%s2821_s0 + $0xc0] sm:$0xff]  }
   0xb   :  { %1835 = vmatprep.mubr.msk.bf16.mxu0 %vm286_vm0, %v1972_v4  ;;  %1898 = vmatpush3.bf16.msra.mxu1 %v2003_v12  ;;  %v2005_v30 = vld [vmem:[%s2822_s3 + $0x18] ss:$0 sps:$4 sm:$0x11]   ;;  %v1995_v32 = vld [vmem:[%s2821_s0 + $0xc8] sm:$0xff]   ;;  %v1996_v33 = vld [vmem:[%s2821_s0 + $0xd0] sm:$0xff]  }
   0xc   :  { %1899 = vmatprep.subr.bf16.mxu1 %v2004_v28  ;;  %v894_v31 = vsel %vm892_vm1, %v2005_v30, 0  ;;  %v1997_v34 = vld [vmem:[%s2821_s0 + $0xd8] sm:$0xff]   ;;  %v1998_v35 = vld [vmem:[%s2821_s0 + $0xe0] sm:$0xff]   ;;  %v1999_v36 = vld [vmem:[%s2821_s0 + $0xe8] sm:$0xff]  }
   0xd   :  { %v2000_v37 = vld [vmem:[%s2821_s0 + $0xf0] sm:$0xff]   ;;  %v2001_v38 = vld [vmem:[%s2821_s0 + $0xf8] sm:$0xff]   ;;  %v2195_v39 = vld [vmem:[%s2823_s2] ss:$0 sm:$0xff] }
   0xf   :  { %1900 = vmatpush3.bf16.msra.mxu1 %v2004_v28 }
  0x10   :  { %1967 = vmatprep.subr.msk.bf16.mxu1 %vm892_vm1, %v2005_v30 }
  0x12   :  { %1836 = vmatmul.mubr.msk.bf16.gmra.mrb[4].mxu0 %vm286_vm0, %v1973_v5 }
  0x13   :  { %1839 = vmatprep.mubr.msk.bf16.mxu0 %vm286_vm0, %v1974_v6  ;;  %1902 = vmatpush3.bf16.msra.mxu1 %v894_v31 }
  0x1a   :  { %1840 = vmatmul.mubr.msk.bf16.gmra.mrb[8].mxu0 %vm286_vm0, %v1975_v7 }
  0x1b   :  { %1843 = vmatprep.mubr.msk.bf16.mxu0 %vm286_vm0, %v1976_v8 }
  0x22   :  { %1844 = vmatmul.mubr.msk.bf16.gmra.mrb[12].mxu0 %vm286_vm0, %v1977_v9 }
  0x23   :  { %1847 = vmatprep.mubr.msk.bf16.mxu0 %vm286_vm0, %v1978_v10 }
  0x2a   :  { %1848 = vmatmul.mubr.msk.bf16.gmra.mrb[16].mxu0 %vm286_vm0, %v1979_v13 }
  0x2b   :  { %1851 = vmatprep.mubr.msk.bf16.mxu0 %vm286_vm0, %v1980_v14 }
  0x32   :  { %1852 = vmatmul.mubr.msk.bf16.gmra.mrb[20].mxu0 %vm286_vm0, %v1981_v15 }
  0x33   :  { %1855 = vmatprep.mubr.msk.bf16.mxu0 %vm286_vm0, %v1982_v16 }
  0x3a   :  { %1856 = vmatmul.mubr.msk.bf16.gmra.mrb[24].mxu0 %vm286_vm0, %v1983_v17 }
  0x3b   :  { %1859 = vmatprep.mubr.msk.bf16.mxu0 %vm286_vm0, %v1984_v18 }
  0x42   :  { %1860 = vmatmul.mubr.msk.bf16.gmra.mrb[28].mxu0 %vm286_vm0, %v1985_v19 }
  0x43   :  { %1863 = vmatprep.mubr.msk.bf16.mxu0 %vm286_vm0, %v1986_v20 }
  0x4a   :  { %1864 = vmatmul.mubr.msk.bf16.gmra.mrb[32].mxu0 %vm286_vm0, %v1987_v21 }
  0x4b   :  { %1867 = vmatprep.mubr.msk.bf16.mxu0 %vm286_vm0, %v1988_v22 }
  0x52   :  { %1868 = vmatmul.mubr.msk.bf16.gmra.mrb[36].mxu0 %vm286_vm0, %v1989_v23 }
  0x53   :  { %1871 = vmatprep.mubr.msk.bf16.mxu0 %vm286_vm0, %v1990_v24 }
  0x5a   :  { %1872 = vmatmul.mubr.msk.bf16.gmra.mrb[40].mxu0 %vm286_vm0, %v1991_v25 }
  0x5b   :  { %1875 = vmatprep.mubr.msk.bf16.mxu0 %vm286_vm0, %v1992_v26 }
  0x62   :  { %1876 = vmatmul.mubr.msk.bf16.gmra.mrb[44].mxu0 %vm286_vm0, %v1993_v27 }
  0x63   :  { %1879 = vmatprep.mubr.msk.bf16.mxu0 %vm286_vm0, %v1994_v29 }
  0x6a   :  { %1880 = vmatmul.mubr.msk.bf16.gmra.mrb[48].mxu0 %vm286_vm0, %v1995_v32 }
  0x6b   :  { %1883 = vmatprep.mubr.msk.bf16.mxu0 %vm286_vm0, %v1996_v33 }
  0x72   :  { %1884 = vmatmul.mubr.msk.bf16.gmra.mrb[52].mxu0 %vm286_vm0, %v1997_v34 }
  0x73   :  { %1887 = vmatprep.mubr.msk.bf16.mxu0 %vm286_vm0, %v1998_v35 }
  0x7a   :  { %1888 = vmatmul.mubr.msk.bf16.gmra.mrb[56].mxu0 %vm286_vm0, %v1999_v36 }
  0x7b   :  { %1891 = vmatprep.mubr.msk.bf16.mxu0 %vm286_vm0, %v2000_v37 }
  0x82   :  { %1892 = vmatmul.mubr.msk.bf16.gmra.mrb[60].mxu0 %vm286_vm0, %v2001_v38 }
  0xdd   :  { %v1833_v40 = vpop.f32.mrb[0].mxu0 }
  0xde   :  { %v426_v41 = vadd.f32 %v1833_v40, %v2195_v39  ;;  %v417_v42 = vpop.f32.mrb[1].mxu0 }
  0xdf   :  { %v418_v43 = vadd.f32 %v2195_v39, %v417_v42  ;;  %v1834_v44 = vpop.f32.mrb[2].mxu0 }
  0xe0   :  { %v429_v45 = vadd.f32 %v1834_v44, %v2195_v39  ;;  %v420_v46 = vpop.f32.mrb[3].mxu0  ;;  %v674_v48 = vmax.f32 %v426_v41, 0.0 }
  0xe1   :  { %v421_v47 = vadd.f32 %v2195_v39, %v420_v46  ;;  %v672_v50 = vmax.f32 %v418_v43, 0.0 }
  0xe2   :  { %v675_v49 = vmax.f32 %v429_v45, 0.0 }
  0xe3   :  { %v673_v51 = vmax.f32 %v421_v47, 0.0 }
  0xe4   :  { %v737_v52 = vpack.c.bf16 %v675_v49, %v674_v48 }
  0xe5   :  { %v1837_v53 = vpop.f32.mrb[4].mxu0  ;;  %v736_v54 = vpack.c.bf16 %v673_v51, %v672_v50 }
  0xe6   :  { %v442_v55 = vadd.f32 %v1837_v53, %v2195_v39  ;;  %v433_v56 = vpop.f32.mrb[5].mxu0 }
  0xe7   :  { %v434_v57 = vadd.f32 %v2195_v39, %v433_v56  ;;  %v1838_v58 = vpop.f32.mrb[6].mxu0  ;;  %1903 = vmatprep.mubr.msk.bf16.mxu1 %vm795_vm2, %v736_v54 }
  0xe8   :  { %v445_v59 = vadd.f32 %v1838_v58, %v2195_v39  ;;  %v436_v60 = vpop.f32.mrb[7].mxu0  ;;  %1904 = vmatmul.mubr.msk.bf16.vlgmr.msra.gmra.mrb[0].mxu1 %vm795_vm2, %v737_v52  ;;  %v678_v62 = vmax.f32 %v442_v55, 0.0 }
  0xe9   :  { %v437_v61 = vadd.f32 %v2195_v39, %v436_v60  ;;  %v676_v0 = vmax.f32 %v434_v57, 0.0 }
  0xea   :  { %v679_v63 = vmax.f32 %v445_v59, 0.0 }
  0xeb   :  { %v677_v1 = vmax.f32 %v437_v61, 0.0 }
  0xec   :  { %v739_v2 = vpack.c.bf16 %v679_v63, %v678_v62 }
  0xed   :  { %v738_v3 = vpack.c.bf16 %v677_v1, %v676_v0  ;;  %v1841_v4 = vpop.f32.mrb[8].mxu0 }
  0xee   :  { %v458_v5 = vadd.f32 %v1841_v4, %v2195_v39  ;;  %v449_v6 = vpop.f32.mrb[9].mxu0 }
  0xef   :  { %v450_v7 = vadd.f32 %v2195_v39, %v449_v6  ;;  %v1842_v8 = vpop.f32.mrb[10].mxu0  ;;  %1907 = vmatprep.mubr.msk.bf16.mxu1 %vm795_vm2, %v738_v3 }
  0xf0   :  { %v461_v9 = vadd.f32 %v1842_v8, %v2195_v39  ;;  %v452_v10 = vpop.f32.mrb[11].mxu0  ;;  %1908 = vmatmul.mubr.msk.bf16.gmra.mrb[4].mxu1 %vm795_vm2, %v739_v2  ;;  %v682_v12 = vmax.f32 %v458_v5, 0.0 }
  0xf1   :  { %v453_v11 = vadd.f32 %v2195_v39, %v452_v10  ;;  %v680_v14 = vmax.f32 %v450_v7, 0.0 }
  0xf2   :  { %v683_v13 = vmax.f32 %v461_v9, 0.0 }
  0xf3   :  { %v681_v15 = vmax.f32 %v453_v11, 0.0 }
  0xf4   :  { %v741_v16 = vpack.c.bf16 %v683_v13, %v682_v12 }
  0xf5   :  { %v740_v17 = vpack.c.bf16 %v681_v15, %v680_v14  ;;  %v1845_v18 = vpop.f32.mrb[12].mxu0 }
  0xf6   :  { %v474_v19 = vadd.f32 %v1845_v18, %v2195_v39  ;;  %v465_v20 = vpop.f32.mrb[13].mxu0 }
  0xf7   :  { %v466_v21 = vadd.f32 %v2195_v39, %v465_v20  ;;  %v1846_v22 = vpop.f32.mrb[14].mxu0  ;;  %1911 = vmatprep.mubr.msk.bf16.mxu1 %vm795_vm2, %v740_v17 }
  0xf8   :  { %v477_v23 = vadd.f32 %v1846_v22, %v2195_v39  ;;  %v468_v24 = vpop.f32.mrb[15].mxu0  ;;  %1912 = vmatmul.mubr.msk.bf16.gmra.mrb[8].mxu1 %vm795_vm2, %v741_v16  ;;  %v686_v26 = vmax.f32 %v474_v19, 0.0 }
  0xf9   :  { %v469_v25 = vadd.f32 %v2195_v39, %v468_v24  ;;  %v684_v28 = vmax.f32 %v466_v21, 0.0 }
  0xfa   :  { %v687_v27 = vmax.f32 %v477_v23, 0.0 }
  0xfb   :  { %v685_v29 = vmax.f32 %v469_v25, 0.0 }
  0xfc   :  { %v743_v30 = vpack.c.bf16 %v687_v27, %v686_v26 }
  0xfd   :  { %v742_v31 = vpack.c.bf16 %v685_v29, %v684_v28  ;;  %v1849_v32 = vpop.f32.mrb[16].mxu0 }
  0xfe   :  { %v490_v33 = vadd.f32 %v1849_v32, %v2195_v39  ;;  %v481_v34 = vpop.f32.mrb[17].mxu0 }
  0xff   :  { %v482_v35 = vadd.f32 %v2195_v39, %v481_v34  ;;  %v1850_v36 = vpop.f32.mrb[18].mxu0  ;;  %1915 = vmatprep.mubr.msk.bf16.mxu1 %vm795_vm2, %v742_v31 }
 0x100   :  { %v493_v37 = vadd.f32 %v1850_v36, %v2195_v39  ;;  %v484_v38 = vpop.f32.mrb[19].mxu0  ;;  %1916 = vmatmul.mubr.msk.bf16.gmra.mrb[12].mxu1 %vm795_vm2, %v743_v30  ;;  %v690_v41 = vmax.f32 %v490_v33, 0.0 }
 0x101   :  { %v485_v40 = vadd.f32 %v2195_v39, %v484_v38  ;;  %v688_v43 = vmax.f32 %v482_v35, 0.0 }
 0x102   :  { %v691_v42 = vmax.f32 %v493_v37, 0.0 }
 0x103   :  { %v689_v44 = vmax.f32 %v485_v40, 0.0 }
 0x104   :  { %v745_v45 = vpack.c.bf16 %v691_v42, %v690_v41 }
 0x105   :  { %v744_v46 = vpack.c.bf16 %v689_v44, %v688_v43  ;;  %v1853_v47 = vpop.f32.mrb[20].mxu0 }
 0x106   :  { %v506_v48 = vadd.f32 %v1853_v47, %v2195_v39  ;;  %v497_v49 = vpop.f32.mrb[21].mxu0 }
 0x107   :  { %v498_v50 = vadd.f32 %v2195_v39, %v497_v49  ;;  %v1854_v51 = vpop.f32.mrb[22].mxu0  ;;  %1919 = vmatprep.mubr.msk.bf16.mxu1 %vm795_vm2, %v744_v46 }
 0x108   :  { %v509_v52 = vadd.f32 %v1854_v51, %v2195_v39  ;;  %v500_v53 = vpop.f32.mrb[23].mxu0  ;;  %1920 = vmatmul.mubr.msk.bf16.gmra.mrb[16].mxu1 %vm795_vm2, %v745_v45  ;;  %v694_v55 = vmax.f32 %v506_v48, 0.0 }
 0x109   :  { %v501_v54 = vadd.f32 %v2195_v39, %v500_v53  ;;  %v692_v57 = vmax.f32 %v498_v50, 0.0 }
 0x10a   :  { %v695_v56 = vmax.f32 %v509_v52, 0.0 }
 0x10b   :  { %v693_v58 = vmax.f32 %v501_v54, 0.0 }
 0x10c   :  { %v747_v59 = vpack.c.bf16 %v695_v56, %v694_v55 }
 0x10d   :  { %v746_v60 = vpack.c.bf16 %v693_v58, %v692_v57  ;;  %v1857_v61 = vpop.f32.mrb[24].mxu0 }
 0x10e   :  { %v522_v62 = vadd.f32 %v1857_v61, %v2195_v39  ;;  %v513_v63 = vpop.f32.mrb[25].mxu0 }
 0x10f   :  { %v514_v0 = vadd.f32 %v2195_v39, %v513_v63  ;;  %v1858_v1 = vpop.f32.mrb[26].mxu0  ;;  %1923 = vmatprep.mubr.msk.bf16.mxu1 %vm795_vm2, %v746_v60 }
 0x110   :  { %v525_v2 = vadd.f32 %v1858_v1, %v2195_v39  ;;  %v516_v3 = vpop.f32.mrb[27].mxu0  ;;  %1924 = vmatmul.mubr.msk.bf16.gmra.mrb[20].mxu1 %vm795_vm2, %v747_v59  ;;  %v698_v5 = vmax.f32 %v522_v62, 0.0 }
 0x111   :  { %v517_v4 = vadd.f32 %v2195_v39, %v516_v3  ;;  %v696_v7 = vmax.f32 %v514_v0, 0.0 }
 0x112   :  { %v699_v6 = vmax.f32 %v525_v2, 0.0 }
 0x113   :  { %v697_v8 = vmax.f32 %v517_v4, 0.0 }
 0x114   :  { %v749_v9 = vpack.c.bf16 %v699_v6, %v698_v5 }
 0x115   :  { %v748_v10 = vpack.c.bf16 %v697_v8, %v696_v7  ;;  %v1861_v11 = vpop.f32.mrb[28].mxu0 }
 0x116   :  { %v538_v12 = vadd.f32 %v1861_v11, %v2195_v39  ;;  %v529_v13 = vpop.f32.mrb[29].mxu0 }
 0x117   :  { %v530_v14 = vadd.f32 %v2195_v39, %v529_v13  ;;  %v1862_v15 = vpop.f32.mrb[30].mxu0  ;;  %1927 = vmatprep.mubr.msk.bf16.mxu1 %vm795_vm2, %v748_v10 }
 0x118   :  { %v541_v16 = vadd.f32 %v1862_v15, %v2195_v39  ;;  %v532_v17 = vpop.f32.mrb[31].mxu0  ;;  %1928 = vmatmul.mubr.msk.bf16.gmra.mrb[24].mxu1 %vm795_vm2, %v749_v9  ;;  %v702_v19 = vmax.f32 %v538_v12, 0.0 }
 0x119   :  { %v533_v18 = vadd.f32 %v2195_v39, %v532_v17  ;;  %v700_v21 = vmax.f32 %v530_v14, 0.0 }
 0x11a   :  { %v703_v20 = vmax.f32 %v541_v16, 0.0 }
 0x11b   :  { %v701_v22 = vmax.f32 %v533_v18, 0.0 }
 0x11c   :  { %v751_v23 = vpack.c.bf16 %v703_v20, %v702_v19 }
 0x11d   :  { %v750_v24 = vpack.c.bf16 %v701_v22, %v700_v21  ;;  %v1865_v25 = vpop.f32.mrb[32].mxu0 }
 0x11e   :  { %v554_v26 = vadd.f32 %v1865_v25, %v2195_v39  ;;  %v545_v27 = vpop.f32.mrb[33].mxu0 }
 0x11f   :  { %v546_v28 = vadd.f32 %v2195_v39, %v545_v27  ;;  %v1866_v29 = vpop.f32.mrb[34].mxu0  ;;  %1931 = vmatprep.mubr.msk.bf16.mxu1 %vm795_vm2, %v750_v24 }
 0x120   :  { %v557_v30 = vadd.f32 %v1866_v29, %v2195_v39  ;;  %v548_v31 = vpop.f32.mrb[35].mxu0  ;;  %1932 = vmatmul.mubr.msk.bf16.gmra.mrb[28].mxu1 %vm795_vm2, %v751_v23  ;;  %v706_v33 = vmax.f32 %v554_v26, 0.0 }
 0x121   :  { %v549_v32 = vadd.f32 %v2195_v39, %v548_v31  ;;  %v704_v35 = vmax.f32 %v546_v28, 0.0 }
 0x122   :  { %v707_v34 = vmax.f32 %v557_v30, 0.0 }
 0x123   :  { %v705_v36 = vmax.f32 %v549_v32, 0.0 }
 0x124   :  { %v753_v37 = vpack.c.bf16 %v707_v34, %v706_v33 }
 0x125   :  { %v752_v38 = vpack.c.bf16 %v705_v36, %v704_v35  ;;  %v1869_v40 = vpop.f32.mrb[36].mxu0 }
 0x126   :  { %v570_v41 = vadd.f32 %v1869_v40, %v2195_v39  ;;  %v561_v42 = vpop.f32.mrb[37].mxu0 }
 0x127   :  { %v562_v43 = vadd.f32 %v2195_v39, %v561_v42  ;;  %v1870_v44 = vpop.f32.mrb[38].mxu0  ;;  %1935 = vmatprep.mubr.msk.bf16.mxu1 %vm795_vm2, %v752_v38 }
 0x128   :  { %v573_v45 = vadd.f32 %v1870_v44, %v2195_v39  ;;  %v564_v46 = vpop.f32.mrb[39].mxu0  ;;  %1936 = vmatmul.mubr.msk.bf16.gmra.mrb[32].mxu1 %vm795_vm2, %v753_v37  ;;  %v710_v48 = vmax.f32 %v570_v41, 0.0 }
 0x129   :  { %v565_v47 = vadd.f32 %v2195_v39, %v564_v46  ;;  %v708_v50 = vmax.f32 %v562_v43, 0.0 }
 0x12a   :  { %v711_v49 = vmax.f32 %v573_v45, 0.0 }
 0x12b   :  { %v709_v51 = vmax.f32 %v565_v47, 0.0 }
 0x12c   :  { %v755_v52 = vpack.c.bf16 %v711_v49, %v710_v48 }
 0x12d   :  { %v754_v53 = vpack.c.bf16 %v709_v51, %v708_v50  ;;  %v1873_v54 = vpop.f32.mrb[40].mxu0 }
 0x12e   :  { %v586_v55 = vadd.f32 %v1873_v54, %v2195_v39  ;;  %v577_v56 = vpop.f32.mrb[41].mxu0 }
 0x12f   :  { %v578_v57 = vadd.f32 %v2195_v39, %v577_v56  ;;  %v1874_v58 = vpop.f32.mrb[42].mxu0  ;;  %1939 = vmatprep.mubr.msk.bf16.mxu1 %vm795_vm2, %v754_v53 }
 0x130   :  { %v589_v59 = vadd.f32 %v1874_v58, %v2195_v39  ;;  %v580_v60 = vpop.f32.mrb[43].mxu0  ;;  %1940 = vmatmul.mubr.msk.bf16.gmra.mrb[36].mxu1 %vm795_vm2, %v755_v52  ;;  %v714_v62 = vmax.f32 %v586_v55, 0.0 }
 0x131   :  { %v581_v61 = vadd.f32 %v2195_v39, %v580_v60  ;;  %v712_v0 = vmax.f32 %v578_v57, 0.0 }
 0x132   :  { %v715_v63 = vmax.f32 %v589_v59, 0.0 }
 0x133   :  { %v713_v1 = vmax.f32 %v581_v61, 0.0 }
 0x134   :  { %v757_v2 = vpack.c.bf16 %v715_v63, %v714_v62 }
 0x135   :  { %v756_v3 = vpack.c.bf16 %v713_v1, %v712_v0  ;;  %v1877_v4 = vpop.f32.mrb[44].mxu0 }
 0x136   :  { %v602_v5 = vadd.f32 %v1877_v4, %v2195_v39  ;;  %v593_v6 = vpop.f32.mrb[45].mxu0 }
 0x137   :  { %v594_v7 = vadd.f32 %v2195_v39, %v593_v6  ;;  %v1878_v8 = vpop.f32.mrb[46].mxu0  ;;  %1943 = vmatprep.mubr.msk.bf16.mxu1 %vm795_vm2, %v756_v3 }
 0x138   :  { %v605_v9 = vadd.f32 %v1878_v8, %v2195_v39  ;;  %v596_v10 = vpop.f32.mrb[47].mxu0  ;;  %1944 = vmatmul.mubr.msk.bf16.gmra.mrb[40].mxu1 %vm795_vm2, %v757_v2  ;;  %v718_v12 = vmax.f32 %v602_v5, 0.0 }
 0x139   :  { %v597_v11 = vadd.f32 %v2195_v39, %v596_v10  ;;  %v716_v14 = vmax.f32 %v594_v7, 0.0 }
 0x13a   :  { %v719_v13 = vmax.f32 %v605_v9, 0.0 }
 0x13b   :  { %v717_v15 = vmax.f32 %v597_v11, 0.0  ;;  %v2296_v11 = vld [vmem:[%s2824_s4] ss:$0 sm:$0xff] }
 0x13c   :  { %v759_v16 = vpack.c.bf16 %v719_v13, %v718_v12 }
 0x13d   :  { %v758_v17 = vpack.c.bf16 %v717_v15, %v716_v14  ;;  %v1881_v18 = vpop.f32.mrb[48].mxu0 }
 0x13e   :  { %v618_v19 = vadd.f32 %v1881_v18, %v2195_v39  ;;  %v609_v20 = vpop.f32.mrb[49].mxu0 }
 0x13f   :  { %v610_v21 = vadd.f32 %v2195_v39, %v609_v20  ;;  %v1882_v22 = vpop.f32.mrb[50].mxu0  ;;  %1947 = vmatprep.mubr.msk.bf16.mxu1 %vm795_vm2, %v758_v17 }
 0x140   :  { %v621_v23 = vadd.f32 %v1882_v22, %v2195_v39  ;;  %v612_v24 = vpop.f32.mrb[51].mxu0  ;;  %1948 = vmatmul.mubr.msk.bf16.gmra.mrb[44].mxu1 %vm795_vm2, %v759_v16  ;;  %v722_v26 = vmax.f32 %v618_v19, 0.0  ;;  %v2303_v16 = vld [vmem:[%s2825_s5] ss:$0 sm:$0xff] }
 0x141   :  { %v613_v25 = vadd.f32 %v2195_v39, %v612_v24  ;;  %v720_v28 = vmax.f32 %v610_v21, 0.0 }
 0x142   :  { %v723_v27 = vmax.f32 %v621_v23, 0.0 }
 0x143   :  { %v721_v29 = vmax.f32 %v613_v25, 0.0 }
 0x144   :  { %v761_v30 = vpack.c.bf16 %v723_v27, %v722_v26 }
 0x145   :  { %v760_v31 = vpack.c.bf16 %v721_v29, %v720_v28  ;;  %v1885_v32 = vpop.f32.mrb[52].mxu0 }
 0x146   :  { %v634_v33 = vadd.f32 %v1885_v32, %v2195_v39  ;;  %v625_v34 = vpop.f32.mrb[53].mxu0 }
 0x147   :  { %v626_v35 = vadd.f32 %v2195_v39, %v625_v34  ;;  %v1886_v36 = vpop.f32.mrb[54].mxu0  ;;  %1951 = vmatprep.mubr.msk.bf16.mxu1 %vm795_vm2, %v760_v31  ;;  %v12_v31 = vstv %s2826_s6 }
 0x148   :  { %v637_v37 = vadd.f32 %v1886_v36, %v2195_v39  ;;  %v628_v38 = vpop.f32.mrb[55].mxu0  ;;  %1952 = vmatmul.mubr.msk.bf16.gmra.mrb[48].mxu1 %vm795_vm2, %v761_v30  ;;  %v726_v41 = vmax.f32 %v634_v33, 0.0  ;;  %13 = vst [vmem:[#allocation2] sm:$0x1] %v12_v31 }
 0x149   :  { %v629_v40 = vadd.f32 %v2195_v39, %v628_v38  ;;  %v724_v43 = vmax.f32 %v626_v35, 0.0 }
 0x14a   :  { %v727_v42 = vmax.f32 %v637_v37, 0.0 }
 0x14b   :  { %v725_v44 = vmax.f32 %v629_v40, 0.0 }
 0x14c   :  { %v763_v45 = vpack.c.bf16 %v727_v42, %v726_v41 }
 0x14d   :  { %v762_v46 = vpack.c.bf16 %v725_v44, %v724_v43  ;;  %v1889_v47 = vpop.f32.mrb[56].mxu0 }
 0x14e   :  { %v650_v48 = vadd.f32 %v1889_v47, %v2195_v39  ;;  %v641_v49 = vpop.f32.mrb[57].mxu0 }
 0x14f   :  { %v642_v50 = vadd.f32 %v2195_v39, %v641_v49  ;;  %v1890_v51 = vpop.f32.mrb[58].mxu0  ;;  %1955 = vmatprep.mubr.msk.bf16.mxu1 %vm795_vm2, %v762_v46 }
 0x150   :  { %v653_v52 = vadd.f32 %v1890_v51, %v2195_v39  ;;  %v644_v53 = vpop.f32.mrb[59].mxu0  ;;  %1956 = vmatmul.mubr.msk.bf16.gmra.mrb[52].mxu1 %vm795_vm2, %v763_v45  ;;  %v730_v55 = vmax.f32 %v650_v48, 0.0 }
 0x151   :  { %v645_v54 = vadd.f32 %v2195_v39, %v644_v53  ;;  %v728_v57 = vmax.f32 %v642_v50, 0.0 }
 0x152   :  { %v731_v56 = vmax.f32 %v653_v52, 0.0 }
 0x153   :  { %v729_v58 = vmax.f32 %v645_v54, 0.0 }
 0x154   :  { %v765_v59 = vpack.c.bf16 %v731_v56, %v730_v55 }
 0x155   :  { %v764_v60 = vpack.c.bf16 %v729_v58, %v728_v57  ;;  %v1893_v61 = vpop.f32.mrb[60].mxu0 }
 0x156   :  { %v666_v62 = vadd.f32 %v1893_v61, %v2195_v39  ;;  %v657_v63 = vpop.f32.mrb[61].mxu0 }
 0x157   :  { %v658_v0 = vadd.f32 %v2195_v39, %v657_v63  ;;  %v1894_v1 = vpop.f32.mrb[62].mxu0  ;;  %1959 = vmatprep.mubr.msk.bf16.mxu1 %vm795_vm2, %v764_v60 }
 0x158   :  { %v669_v2 = vadd.f32 %v1894_v1, %v2195_v39  ;;  %v660_v3 = vpop.f32.mrb[63].mxu0  ;;  %1960 = vmatmul.mubr.msk.bf16.gmra.mrb[56].mxu1 %vm795_vm2, %v765_v59  ;;  %v734_v5 = vmax.f32 %v666_v62, 0.0 }
 0x159   :  { %v661_v4 = vadd.f32 %v2195_v39, %v660_v3  ;;  %v732_v7 = vmax.f32 %v658_v0, 0.0 }
 0x15a   :  { %v735_v6 = vmax.f32 %v669_v2, 0.0 }
 0x15b   :  { %v733_v8 = vmax.f32 %v661_v4, 0.0 }
 0x15c   :  { %v767_v9 = vpack.c.bf16 %v735_v6, %v734_v5 }
 0x15d   :  { %v766_v10 = vpack.c.bf16 %v733_v8, %v732_v7 }
 0x15f   :  { %1963 = vmatprep.mubr.msk.bf16.mxu1 %vm795_vm2, %v766_v10 }
 0x160   :  { %1964 = vmatmul.mubr.msk.bf16.gmra.mrb[60].mxu1 %vm795_vm2, %v767_v9 }
 0x1bb   :  { %v1905_v12 = vpop.f32.mrb[0].mxu1 }
 0x1bc   :  { %v939_v13 = vadd.f32 %v1905_v12, %v2296_v11  ;;  %v930_v14 = vpop.f32.mrb[1].mxu1 }
 0x1bd   :  { %v931_v39 = vadd.f32 %v2296_v11, %v930_v14  ;;  %v1906_v15 = vpop.f32.mrb[2].mxu1 }
 0x1be   :  { %v1187_v17 = vmax.f32 %v939_v13, 0.0  ;;  %v942_v18 = vadd.f32 %v1906_v15, %v2296_v11  ;;  %v933_v19 = vpop.f32.mrb[3].mxu1 }
 0x1bf   :  { %v1185_v20 = vmax.f32 %v931_v39, 0.0  ;;  %v934_v21 = vadd.f32 %v2296_v11, %v933_v19 }
 0x1c0   :  { %v1188_v22 = vmax.f32 %v942_v18, 0.0  ;;  %v1257_v23 = vmul.f32 %v2303_v16, %v1187_v17 }
 0x1c1   :  { %v1186_v24 = vmax.f32 %v934_v21, 0.0  ;;  %v1255_v25 = vmul.f32 %v2303_v16, %v1185_v20 }
 0x1c2   :  { %v1326_v26 = vsel %vm1319_vm3, %v1257_v23, 0.0  ;;  %v1258_v27 = vmul.f32 %v2303_v16, %v1188_v22 }
 0x1c3   :  { %1327 = vadd.xlane.f32.xlu1 %v1326_v26  ;;  %v1909_v28 = vpop.f32.mrb[4].mxu1  ;;  %v1320_v29 = vsel %vm1319_vm3, %v1255_v25, 0.0  ;;  %v1256_v30 = vmul.f32 %v2303_v16, %v1186_v24 }
 0x1c4   :  { %v955_v32 = vadd.f32 %v1909_v28, %v2296_v11  ;;  %v946_v33 = vpop.f32.mrb[5].mxu1  ;;  %1321 = vadd.xlane.f32.xlu0 %v1320_v29  ;;  %v1329_v40 = vsel %vm1319_vm3, %v1258_v27, 0.0 }
 0x1c5   :  { %v947_v34 = vadd.f32 %v2296_v11, %v946_v33  ;;  %v1910_v35 = vpop.f32.mrb[6].mxu1  ;;  %v1323_v43 = vsel %vm1319_vm3, %v1256_v30, 0.0 }
 0x1c6   :  { %v1191_v36 = vmax.f32 %v955_v32, 0.0  ;;  %v958_v37 = vadd.f32 %v1910_v35, %v2296_v11  ;;  %v949_v38 = vpop.f32.mrb[7].mxu1 }
 0x1c7   :  { %v1189_v41 = vmax.f32 %v947_v34, 0.0  ;;  %v950_v42 = vadd.f32 %v2296_v11, %v949_v38  ;;  %1330 = vadd.xlane.f32.xlu1 %v1329_v40 }
 0x1c8   :  { %v1192_v44 = vmax.f32 %v958_v37, 0.0  ;;  %1324 = vadd.xlane.f32.xlu0 %v1323_v43  ;;  %v1261_v45 = vmul.f32 %v2303_v16, %v1191_v36 }
 0x1c9   :  { %v1190_v46 = vmax.f32 %v950_v42, 0.0  ;;  %v1259_v50 = vmul.f32 %v2303_v16, %v1189_v41 }
 0x1ca   :  { %v1338_v47 = vsel %vm1319_vm3, %v1261_v45, 0.0  ;;  %v1262_v48 = vmul.f32 %v2303_v16, %v1192_v44 }
 0x1cb   :  { %v1913_v49 = vpop.f32.mrb[8].mxu1  ;;  %v1260_v54 = vmul.f32 %v2303_v16, %v1190_v46  ;;  %v1332_v62 = vsel %vm1319_vm3, %v1259_v50, 0.0 }
 0x1cc   :  { %v971_v51 = vadd.f32 %v1913_v49, %v2296_v11  ;;  %v962_v52 = vpop.f32.mrb[9].mxu1  ;;  %1339 = vadd.xlane.f32.xlu0 %v1338_v47  ;;  %v1341_v53 = vsel %vm1319_vm3, %v1262_v48, 0.0 }
 0x1cd   :  { %v963_v55 = vadd.f32 %v2296_v11, %v962_v52  ;;  %1342 = vadd.xlane.f32.xlu1 %v1341_v53  ;;  %v1914_v56 = vpop.f32.mrb[10].mxu1  ;;  %v1335_v0 = vsel %vm1319_vm3, %v1260_v54, 0.0 }
 0x1ce   :  { %v1195_v57 = vmax.f32 %v971_v51, 0.0  ;;  %v974_v58 = vadd.f32 %v1914_v56, %v2296_v11  ;;  %v965_v59 = vpop.f32.mrb[11].mxu1 }
 0x1cf   :  { %v1193_v60 = vmax.f32 %v963_v55, 0.0  ;;  %v966_v61 = vadd.f32 %v2296_v11, %v965_v59 }
 0x1d0   :  { %v1196_v63 = vmax.f32 %v974_v58, 0.0  ;;  %1333 = vadd.xlane.f32.xlu0 %v1332_v62  ;;  %v1265_v1 = vmul.f32 %v2303_v16, %v1195_v57 }
 0x1d1   :  { %v1194_v2 = vmax.f32 %v966_v61, 0.0  ;;  %1336 = vadd.xlane.f32.xlu1 %v1335_v0  ;;  %v1263_v6 = vmul.f32 %v2303_v16, %v1193_v60 }
 0x1d2   :  { %v1350_v3 = vsel %vm1319_vm3, %v1265_v1, 0.0  ;;  %v1266_v4 = vmul.f32 %v2303_v16, %v1196_v63 }
 0x1d3   :  { %v1917_v5 = vpop.f32.mrb[12].mxu1  ;;  %v1264_v10 = vmul.f32 %v2303_v16, %v1194_v2  ;;  %v1344_v19 = vsel %vm1319_vm3, %v1263_v6, 0.0 }
 0x1d4   :  { %v987_v7 = vadd.f32 %v1917_v5, %v2296_v11  ;;  %v978_v8 = vpop.f32.mrb[13].mxu1  ;;  %1351 = vadd.xlane.f32.xlu0 %v1350_v3  ;;  %v1353_v9 = vsel %vm1319_vm3, %v1266_v4, 0.0 }
 0x1d5   :  { %v979_v12 = vadd.f32 %v2296_v11, %v978_v8  ;;  %v1918_v13 = vpop.f32.mrb[14].mxu1  ;;  %1354 = vadd.xlane.f32.xlu1 %v1353_v9  ;;  %v1347_v21 = vsel %vm1319_vm3, %v1264_v10, 0.0 }
 0x1d6   :  { %v1199_v14 = vmax.f32 %v987_v7, 0.0  ;;  %v990_v39 = vadd.f32 %v1918_v13, %v2296_v11  ;;  %v981_v15 = vpop.f32.mrb[15].mxu1 }
 0x1d7   :  { %v1197_v17 = vmax.f32 %v979_v12, 0.0  ;;  %v982_v18 = vadd.f32 %v2296_v11, %v981_v15 }
 0x1d8   :  { %v1200_v20 = vmax.f32 %v990_v39, 0.0  ;;  %1345 = vadd.xlane.f32.xlu0 %v1344_v19  ;;  %v1269_v22 = vmul.f32 %v2303_v16, %v1199_v14 }
 0x1d9   :  { %v1198_v23 = vmax.f32 %v982_v18, 0.0  ;;  %1348 = vadd.xlane.f32.xlu1 %v1347_v21  ;;  %v1267_v27 = vmul.f32 %v2303_v16, %v1197_v17 }
 0x1da   :  { %v1362_v24 = vsel %vm1319_vm3, %v1269_v22, 0.0  ;;  %v1270_v25 = vmul.f32 %v2303_v16, %v1200_v20 }
 0x1db   :  { %v1921_v26 = vpop.f32.mrb[16].mxu1  ;;  %v1268_v31 = vmul.f32 %v2303_v16, %v1198_v23  ;;  %v1356_v40 = vsel %vm1319_vm3, %v1267_v27, 0.0 }
 0x1dc   :  { %v1003_v28 = vadd.f32 %v1921_v26, %v2296_v11  ;;  %v994_v29 = vpop.f32.mrb[17].mxu1  ;;  %1363 = vadd.xlane.f32.xlu0 %v1362_v24  ;;  %v1365_v30 = vsel %vm1319_vm3, %v1270_v25, 0.0 }
 0x1dd   :  { %v995_v32 = vadd.f32 %v2296_v11, %v994_v29  ;;  %v1922_v33 = vpop.f32.mrb[18].mxu1  ;;  %1366 = vadd.xlane.f32.xlu1 %v1365_v30  ;;  %v1359_v42 = vsel %vm1319_vm3, %v1268_v31, 0.0 }
 0x1de   :  { %v1203_v34 = vmax.f32 %v1003_v28, 0.0  ;;  %v1006_v35 = vadd.f32 %v1922_v33, %v2296_v11  ;;  %v997_v36 = vpop.f32.mrb[19].mxu1 }
 0x1df   :  { %v1201_v37 = vmax.f32 %v995_v32, 0.0  ;;  %v998_v38 = vadd.f32 %v2296_v11, %v997_v36 }
 0x1e0   :  { %v1204_v41 = vmax.f32 %v1006_v35, 0.0  ;;  %1357 = vadd.xlane.f32.xlu0 %v1356_v40  ;;  %v1273_v43 = vmul.f32 %v2303_v16, %v1203_v34 }
 0x1e1   :  { %v1202_v44 = vmax.f32 %v998_v38, 0.0  ;;  %1360 = vadd.xlane.f32.xlu1 %v1359_v42  ;;  %v1271_v48 = vmul.f32 %v2303_v16, %v1201_v37 }
 0x1e2   :  { %v1374_v45 = vsel %vm1319_vm3, %v1273_v43, 0.0  ;;  %v1274_v46 = vmul.f32 %v2303_v16, %v1204_v41 }
 0x1e3   :  { %v1925_v47 = vpop.f32.mrb[20].mxu1  ;;  %v1272_v52 = vmul.f32 %v2303_v16, %v1202_v44  ;;  %v1368_v60 = vsel %vm1319_vm3, %v1271_v48, 0.0 }
 0x1e4   :  { %v1019_v49 = vadd.f32 %v1925_v47, %v2296_v11  ;;  %v1010_v50 = vpop.f32.mrb[21].mxu1  ;;  %1375 = vadd.xlane.f32.xlu0 %v1374_v45  ;;  %v1377_v51 = vsel %vm1319_vm3, %v1274_v46, 0.0 }
 0x1e5   :  { %v1011_v53 = vadd.f32 %v2296_v11, %v1010_v50  ;;  %v1926_v54 = vpop.f32.mrb[22].mxu1  ;;  %1378 = vadd.xlane.f32.xlu1 %v1377_v51  ;;  %v1371_v62 = vsel %vm1319_vm3, %v1272_v52, 0.0 }
 0x1e6   :  { %v1207_v55 = vmax.f32 %v1019_v49, 0.0  ;;  %v1022_v56 = vadd.f32 %v1926_v54, %v2296_v11  ;;  %v1013_v57 = vpop.f32.mrb[23].mxu1 }
 0x1e7   :  { %v1205_v58 = vmax.f32 %v1011_v53, 0.0  ;;  %v1014_v59 = vadd.f32 %v2296_v11, %v1013_v57 }
 0x1e8   :  { %v1208_v61 = vmax.f32 %v1022_v56, 0.0  ;;  %1369 = vadd.xlane.f32.xlu0 %v1368_v60  ;;  %v1277_v63 = vmul.f32 %v2303_v16, %v1207_v55 }
 0x1e9   :  { %v1206_v0 = vmax.f32 %v1014_v59, 0.0  ;;  %1372 = vadd.xlane.f32.xlu1 %v1371_v62  ;;  %v1275_v4 = vmul.f32 %v2303_v16, %v1205_v58 }
 0x1ea   :  { %v1386_v1 = vsel %vm1319_vm3, %v1277_v63, 0.0  ;;  %v1278_v2 = vmul.f32 %v2303_v16, %v1208_v61 }
 0x1eb   :  { %v1929_v3 = vpop.f32.mrb[24].mxu1  ;;  %v1276_v8 = vmul.f32 %v2303_v16, %v1206_v0  ;;  %v1380_v17 = vsel %vm1319_vm3, %v1275_v4, 0.0 }
 0x1ec   :  { %v1035_v5 = vadd.f32 %v1929_v3, %v2296_v11  ;;  %v1026_v6 = vpop.f32.mrb[25].mxu1  ;;  %1387 = vadd.xlane.f32.xlu0 %v1386_v1  ;;  %v1389_v7 = vsel %vm1319_vm3, %v1278_v2, 0.0 }
 0x1ed   :  { %v1027_v9 = vadd.f32 %v2296_v11, %v1026_v6  ;;  %v1930_v10 = vpop.f32.mrb[26].mxu1  ;;  %1390 = vadd.xlane.f32.xlu1 %v1389_v7  ;;  %v1383_v19 = vsel %vm1319_vm3, %v1276_v8, 0.0 }
 0x1ee   :  { %v1211_v12 = vmax.f32 %v1035_v5, 0.0  ;;  %v1038_v13 = vadd.f32 %v1930_v10, %v2296_v11  ;;  %v1029_v14 = vpop.f32.mrb[27].mxu1 }
 0x1ef   :  { %v1209_v39 = vmax.f32 %v1027_v9, 0.0  ;;  %v1030_v15 = vadd.f32 %v2296_v11, %v1029_v14 }
 0x1f0   :  { %v1212_v18 = vmax.f32 %v1038_v13, 0.0  ;;  %1381 = vadd.xlane.f32.xlu0 %v1380_v17  ;;  %v1281_v20 = vmul.f32 %v2303_v16, %v1211_v12 }
 0x1f1   :  { %v1210_v21 = vmax.f32 %v1030_v15, 0.0  ;;  %1384 = vadd.xlane.f32.xlu1 %v1383_v19  ;;  %v1279_v25 = vmul.f32 %v2303_v16, %v1209_v39 }
 0x1f2   :  { %v1398_v22 = vsel %vm1319_vm3, %v1281_v20, 0.0  ;;  %v1282_v23 = vmul.f32 %v2303_v16, %v1212_v18 }
 0x1f3   :  { %v1933_v24 = vpop.f32.mrb[28].mxu1  ;;  %v1280_v29 = vmul.f32 %v2303_v16, %v1210_v21  ;;  %v1392_v37 = vsel %vm1319_vm3, %v1279_v25, 0.0 }
 0x1f4   :  { %v1051_v26 = vadd.f32 %v1933_v24, %v2296_v11  ;;  %v1042_v27 = vpop.f32.mrb[29].mxu1  ;;  %1399 = vadd.xlane.f32.xlu0 %v1398_v22  ;;  %v1401_v28 = vsel %vm1319_vm3, %v1282_v23, 0.0 }
 0x1f5   :  { %v1043_v30 = vadd.f32 %v2296_v11, %v1042_v27  ;;  %v1934_v31 = vpop.f32.mrb[30].mxu1  ;;  %1402 = vadd.xlane.f32.xlu1 %v1401_v28  ;;  %v1395_v40 = vsel %vm1319_vm3, %v1280_v29, 0.0 }
 0x1f6   :  { %v1215_v32 = vmax.f32 %v1051_v26, 0.0  ;;  %v1054_v33 = vadd.f32 %v1934_v31, %v2296_v11  ;;  %v1045_v34 = vpop.f32.mrb[31].mxu1 }
 0x1f7   :  { %v1213_v35 = vmax.f32 %v1043_v30, 0.0  ;;  %v1046_v36 = vadd.f32 %v2296_v11, %v1045_v34 }
 0x1f8   :  { %v1216_v38 = vmax.f32 %v1054_v33, 0.0  ;;  %1393 = vadd.xlane.f32.xlu0 %v1392_v37  ;;  %v1285_v41 = vmul.f32 %v2303_v16, %v1215_v32 }
 0x1f9   :  { %v1214_v42 = vmax.f32 %v1046_v36, 0.0  ;;  %1396 = vadd.xlane.f32.xlu1 %v1395_v40  ;;  %v1283_v46 = vmul.f32 %v2303_v16, %v1213_v35 }
 0x1fa   :  { %v1410_v43 = vsel %vm1319_vm3, %v1285_v41, 0.0  ;;  %v1286_v44 = vmul.f32 %v2303_v16, %v1216_v38 }
 0x1fb   :  { %v1937_v45 = vpop.f32.mrb[32].mxu1  ;;  %v1284_v50 = vmul.f32 %v2303_v16, %v1214_v42  ;;  %v1404_v58 = vsel %vm1319_vm3, %v1283_v46, 0.0 }
 0x1fc   :  { %v1067_v47 = vadd.f32 %v1937_v45, %v2296_v11  ;;  %v1058_v48 = vpop.f32.mrb[33].mxu1  ;;  %1411 = vadd.xlane.f32.xlu0 %v1410_v43  ;;  %v1413_v49 = vsel %vm1319_vm3, %v1286_v44, 0.0 }
 0x1fd   :  { %v1059_v51 = vadd.f32 %v2296_v11, %v1058_v48  ;;  %v1938_v52 = vpop.f32.mrb[34].mxu1  ;;  %1414 = vadd.xlane.f32.xlu1 %v1413_v49  ;;  %v1407_v60 = vsel %vm1319_vm3, %v1284_v50, 0.0 }
 0x1fe   :  { %v1219_v53 = vmax.f32 %v1067_v47, 0.0  ;;  %v1070_v54 = vadd.f32 %v1938_v52, %v2296_v11  ;;  %v1061_v55 = vpop.f32.mrb[35].mxu1 }
 0x1ff   :  { %v1217_v56 = vmax.f32 %v1059_v51, 0.0  ;;  %v1062_v57 = vadd.f32 %v2296_v11, %v1061_v55 }
 0x200   :  { %v1220_v59 = vmax.f32 %v1070_v54, 0.0  ;;  %1405 = vadd.xlane.f32.xlu0 %v1404_v58  ;;  %v1289_v61 = vmul.f32 %v2303_v16, %v1219_v53 }
 0x201   :  { %v1218_v62 = vmax.f32 %v1062_v57, 0.0  ;;  %1408 = vadd.xlane.f32.xlu1 %v1407_v60  ;;  %v1287_v2 = vmul.f32 %v2303_v16, %v1217_v56 }
 0x202   :  { %v1422_v63 = vsel %vm1319_vm3, %v1289_v61, 0.0  ;;  %v1290_v0 = vmul.f32 %v2303_v16, %v1220_v59 }
 0x203   :  { %v1941_v1 = vpop.f32.mrb[36].mxu1  ;;  %v1288_v6 = vmul.f32 %v2303_v16, %v1218_v62  ;;  %v1416_v39 = vsel %vm1319_vm3, %v1287_v2, 0.0 }
 0x204   :  { %v1083_v3 = vadd.f32 %v1941_v1, %v2296_v11  ;;  %v1074_v4 = vpop.f32.mrb[37].mxu1  ;;  %1423 = vadd.xlane.f32.xlu0 %v1422_v63  ;;  %v1425_v5 = vsel %vm1319_vm3, %v1290_v0, 0.0 }
 0x205   :  { %v1075_v7 = vadd.f32 %v2296_v11, %v1074_v4  ;;  %v1942_v8 = vpop.f32.mrb[38].mxu1  ;;  %1426 = vadd.xlane.f32.xlu1 %v1425_v5  ;;  %v1419_v17 = vsel %vm1319_vm3, %v1288_v6, 0.0 }
 0x206   :  { %v1223_v9 = vmax.f32 %v1083_v3, 0.0  ;;  %v1086_v10 = vadd.f32 %v1942_v8, %v2296_v11  ;;  %v1077_v12 = vpop.f32.mrb[39].mxu1 }
 0x207   :  { %v1221_v13 = vmax.f32 %v1075_v7, 0.0  ;;  %v1078_v14 = vadd.f32 %v2296_v11, %v1077_v12 }
 0x208   :  { %v1224_v15 = vmax.f32 %v1086_v10, 0.0  ;;  %1417 = vadd.xlane.f32.xlu0 %v1416_v39  ;;  %v1293_v18 = vmul.f32 %v2303_v16, %v1223_v9 }
 0x209   :  { %v1222_v19 = vmax.f32 %v1078_v14, 0.0  ;;  %1420 = vadd.xlane.f32.xlu1 %v1419_v17  ;;  %v1291_v23 = vmul.f32 %v2303_v16, %v1221_v13 }
 0x20a   :  { %v1434_v20 = vsel %vm1319_vm3, %v1293_v18, 0.0  ;;  %v1294_v21 = vmul.f32 %v2303_v16, %v1224_v15 }
 0x20b   :  { %v1945_v22 = vpop.f32.mrb[40].mxu1  ;;  %v1292_v27 = vmul.f32 %v2303_v16, %v1222_v19  ;;  %v1428_v35 = vsel %vm1319_vm3, %v1291_v23, 0.0 }
 0x20c   :  { %v1099_v24 = vadd.f32 %v1945_v22, %v2296_v11  ;;  %v1090_v25 = vpop.f32.mrb[41].mxu1  ;;  %1435 = vadd.xlane.f32.xlu0 %v1434_v20  ;;  %v1437_v26 = vsel %vm1319_vm3, %v1294_v21, 0.0 }
 0x20d   :  { %v1091_v28 = vadd.f32 %v2296_v11, %v1090_v25  ;;  %v1946_v29 = vpop.f32.mrb[42].mxu1  ;;  %1438 = vadd.xlane.f32.xlu1 %v1437_v26  ;;  %v1431_v37 = vsel %vm1319_vm3, %v1292_v27, 0.0 }
 0x20e   :  { %v1227_v30 = vmax.f32 %v1099_v24, 0.0  ;;  %v1102_v31 = vadd.f32 %v1946_v29, %v2296_v11  ;;  %v1093_v32 = vpop.f32.mrb[43].mxu1 }
 0x20f   :  { %v1225_v33 = vmax.f32 %v1091_v28, 0.0  ;;  %v1094_v34 = vadd.f32 %v2296_v11, %v1093_v32 }
 0x210   :  { %v1228_v36 = vmax.f32 %v1102_v31, 0.0  ;;  %1429 = vadd.xlane.f32.xlu0 %v1428_v35  ;;  %v1297_v38 = vmul.f32 %v2303_v16, %v1227_v30 }
 0x211   :  { %v1226_v40 = vmax.f32 %v1094_v34, 0.0  ;;  %1432 = vadd.xlane.f32.xlu1 %v1431_v37  ;;  %v1295_v44 = vmul.f32 %v2303_v16, %v1225_v33 }
 0x212   :  { %v1446_v41 = vsel %vm1319_vm3, %v1297_v38, 0.0  ;;  %v1298_v42 = vmul.f32 %v2303_v16, %v1228_v36 }
 0x213   :  { %v1949_v43 = vpop.f32.mrb[44].mxu1  ;;  %v1296_v48 = vmul.f32 %v2303_v16, %v1226_v40  ;;  %v1440_v56 = vsel %vm1319_vm3, %v1295_v44, 0.0 }
 0x214   :  { %v1115_v45 = vadd.f32 %v1949_v43, %v2296_v11  ;;  %v1106_v46 = vpop.f32.mrb[45].mxu1  ;;  %1447 = vadd.xlane.f32.xlu0 %v1446_v41  ;;  %v1449_v47 = vsel %vm1319_vm3, %v1298_v42, 0.0 }
 0x215   :  { %v1107_v49 = vadd.f32 %v2296_v11, %v1106_v46  ;;  %v1950_v50 = vpop.f32.mrb[46].mxu1  ;;  %1450 = vadd.xlane.f32.xlu1 %v1449_v47  ;;  %v1443_v58 = vsel %vm1319_vm3, %v1296_v48, 0.0 }
 0x216   :  { %v1231_v51 = vmax.f32 %v1115_v45, 0.0  ;;  %v1118_v52 = vadd.f32 %v1950_v50, %v2296_v11  ;;  %v1109_v53 = vpop.f32.mrb[47].mxu1 }
 0x217   :  { %v1229_v54 = vmax.f32 %v1107_v49, 0.0  ;;  %v1110_v55 = vadd.f32 %v2296_v11, %v1109_v53 }
 0x218   :  { %v1232_v57 = vmax.f32 %v1118_v52, 0.0  ;;  %1441 = vadd.xlane.f32.xlu0 %v1440_v56  ;;  %v1301_v59 = vmul.f32 %v2303_v16, %v1231_v51 }
 0x219   :  { %v1230_v60 = vmax.f32 %v1110_v55, 0.0  ;;  %1444 = vadd.xlane.f32.xlu1 %v1443_v58  ;;  %v1299_v0 = vmul.f32 %v2303_v16, %v1229_v54 }
 0x21a   :  { %v1458_v61 = vsel %vm1319_vm3, %v1301_v59, 0.0  ;;  %v1302_v62 = vmul.f32 %v2303_v16, %v1232_v57 }
 0x21b   :  { %v1953_v63 = vpop.f32.mrb[48].mxu1  ;;  %v1300_v4 = vmul.f32 %v2303_v16, %v1230_v60  ;;  %v1452_v13 = vsel %vm1319_vm3, %v1299_v0, 0.0 }
 0x21c   :  { %v1131_v1 = vadd.f32 %v1953_v63, %v2296_v11  ;;  %v1122_v2 = vpop.f32.mrb[49].mxu1  ;;  %1459 = vadd.xlane.f32.xlu0 %v1458_v61  ;;  %v1461_v3 = vsel %vm1319_vm3, %v1302_v62, 0.0 }
 0x21d   :  { %v1123_v5 = vadd.f32 %v2296_v11, %v1122_v2  ;;  %v1954_v6 = vpop.f32.mrb[50].mxu1  ;;  %1462 = vadd.xlane.f32.xlu1 %v1461_v3  ;;  %v1455_v39 = vsel %vm1319_vm3, %v1300_v4, 0.0 }
 0x21e   :  { %v1235_v7 = vmax.f32 %v1131_v1, 0.0  ;;  %v1134_v8 = vadd.f32 %v1954_v6, %v2296_v11  ;;  %v1125_v9 = vpop.f32.mrb[51].mxu1 }
 0x21f   :  { %v1233_v10 = vmax.f32 %v1123_v5, 0.0  ;;  %v1126_v12 = vadd.f32 %v2296_v11, %v1125_v9 }
 0x220   :  { %v1236_v14 = vmax.f32 %v1134_v8, 0.0  ;;  %1453 = vadd.xlane.f32.xlu0 %v1452_v13  ;;  %v1305_v15 = vmul.f32 %v2303_v16, %v1235_v7 }
 0x221   :  { %v1234_v17 = vmax.f32 %v1126_v12, 0.0  ;;  %1456 = vadd.xlane.f32.xlu1 %v1455_v39  ;;  %v1303_v21 = vmul.f32 %v2303_v16, %v1233_v10 }
 0x222   :  { %v1470_v18 = vsel %vm1319_vm3, %v1305_v15, 0.0  ;;  %v1306_v19 = vmul.f32 %v2303_v16, %v1236_v14 }
 0x223   :  { %v1957_v20 = vpop.f32.mrb[52].mxu1  ;;  %v1304_v25 = vmul.f32 %v2303_v16, %v1234_v17  ;;  %v1464_v33 = vsel %vm1319_vm3, %v1303_v21, 0.0 }
 0x224   :  { %v1147_v22 = vadd.f32 %v1957_v20, %v2296_v11  ;;  %v1138_v23 = vpop.f32.mrb[53].mxu1  ;;  %1471 = vadd.xlane.f32.xlu0 %v1470_v18  ;;  %v1473_v24 = vsel %vm1319_vm3, %v1306_v19, 0.0 }
 0x225   :  { %v1139_v26 = vadd.f32 %v2296_v11, %v1138_v23  ;;  %v1958_v27 = vpop.f32.mrb[54].mxu1  ;;  %1474 = vadd.xlane.f32.xlu1 %v1473_v24  ;;  %v1467_v35 = vsel %vm1319_vm3, %v1304_v25, 0.0 }
 0x226   :  { %v1239_v28 = vmax.f32 %v1147_v22, 0.0  ;;  %v1150_v29 = vadd.f32 %v1958_v27, %v2296_v11  ;;  %v1141_v30 = vpop.f32.mrb[55].mxu1  ;;  %v2498_v22 = vld [vmem:[#allocation2] ss:$0 sm:$0xff] }
 0x227   :  { %v1237_v31 = vmax.f32 %v1139_v26, 0.0  ;;  %v1142_v32 = vadd.f32 %v2296_v11, %v1141_v30 }
 0x228   :  { %v1240_v34 = vmax.f32 %v1150_v29, 0.0  ;;  %1465 = vadd.xlane.f32.xlu0 %v1464_v33  ;;  %v1309_v36 = vmul.f32 %v2303_v16, %v1239_v28 }
 0x229   :  { %v1238_v37 = vmax.f32 %v1142_v32, 0.0  ;;  %1468 = vadd.xlane.f32.xlu1 %v1467_v35  ;;  %v1307_v42 = vmul.f32 %v2303_v16, %v1237_v31 }
 0x22a   :  { %v1482_v38 = vsel %vm1319_vm3, %v1309_v36, 0.0  ;;  %v1310_v40 = vmul.f32 %v2303_v16, %v1240_v34 }
 0x22b   :  { %v1961_v41 = vpop.f32.mrb[56].mxu1  ;;  %v1308_v46 = vmul.f32 %v2303_v16, %v1238_v37  ;;  %v1476_v54 = vsel %vm1319_vm3, %v1307_v42, 0.0 }
 0x22c   :  { %v1163_v43 = vadd.f32 %v1961_v41, %v2296_v11  ;;  %v1154_v44 = vpop.f32.mrb[57].mxu1  ;;  %1483 = vadd.xlane.f32.xlu0 %v1482_v38  ;;  %v1485_v45 = vsel %vm1319_vm3, %v1310_v40, 0.0 }
 0x22d   :  { %v1155_v47 = vadd.f32 %v2296_v11, %v1154_v44  ;;  %v1962_v48 = vpop.f32.mrb[58].mxu1  ;;  %1486 = vadd.xlane.f32.xlu1 %v1485_v45  ;;  %v1479_v56 = vsel %vm1319_vm3, %v1308_v46, 0.0 }
 0x22e   :  { %v1243_v49 = vmax.f32 %v1163_v43, 0.0  ;;  %v1166_v50 = vadd.f32 %v1962_v48, %v2296_v11  ;;  %v1157_v51 = vpop.f32.mrb[59].mxu1 }
 0x22f   :  { %v1241_v52 = vmax.f32 %v1155_v47, 0.0  ;;  %v1158_v53 = vadd.f32 %v2296_v11, %v1157_v51 }
 0x230   :  { %v1244_v55 = vmax.f32 %v1166_v50, 0.0  ;;  %1477 = vadd.xlane.f32.xlu0 %v1476_v54  ;;  %v1313_v57 = vmul.f32 %v2303_v16, %v1243_v49 }
 0x231   :  { %v1242_v58 = vmax.f32 %v1158_v53, 0.0  ;;  %1480 = vadd.xlane.f32.xlu1 %v1479_v56  ;;  %v1311_v62 = vmul.f32 %v2303_v16, %v1241_v52 }
 0x232   :  { %v1494_v59 = vsel %vm1319_vm3, %v1313_v57, 0.0  ;;  %v1314_v60 = vmul.f32 %v2303_v16, %v1244_v55 }
 0x233   :  { %v1965_v61 = vpop.f32.mrb[60].mxu1  ;;  %v1312_v2 = vmul.f32 %v2303_v16, %v1242_v58  ;;  %v1488_v10 = vsel %vm1319_vm3, %v1311_v62, 0.0 }
 0x234   :  { %v1179_v63 = vadd.f32 %v1965_v61, %v2296_v11  ;;  %v1170_v0 = vpop.f32.mrb[61].mxu1  ;;  %1495 = vadd.xlane.f32.xlu0 %v1494_v59  ;;  %v1497_v1 = vsel %vm1319_vm3, %v1314_v60, 0.0 }
 0x235   :  { %v1171_v3 = vadd.f32 %v2296_v11, %v1170_v0  ;;  %v1966_v4 = vpop.f32.mrb[62].mxu1  ;;  %1498 = vadd.xlane.f32.xlu1 %v1497_v1  ;;  %v1491_v12 = vsel %vm1319_vm3, %v1312_v2, 0.0 }
 0x236   :  { %v1182_v5 = vadd.f32 %v1966_v4, %v2296_v11  ;;  %v1173_v6 = vpop.f32.mrb[63].mxu1  ;;  %v1247_v7 = vmax.f32 %v1179_v63, 0.0 }
 0x237   :  { %v1245_v8 = vmax.f32 %v1171_v3, 0.0  ;;  %v1174_v9 = vadd.f32 %v2296_v11, %v1173_v6 }
 0x238   :  { %1489 = vadd.xlane.f32.xlu0 %v1488_v10  ;;  %v1248_v13 = vmax.f32 %v1182_v5, 0.0  ;;  %v1317_v18 = vmul.f32 %v2303_v16, %v1247_v7 }
 0x239   :  { %v1246_v14 = vmax.f32 %v1174_v9, 0.0  ;;  %1492 = vadd.xlane.f32.xlu1 %v1491_v12  ;;  %v1315_v39 = vmul.f32 %v2303_v16, %v1245_v8 }
 0x23a   :  { %v1318_v11 = vmul.f32 %v2303_v16, %v1248_v13  ;;  %v1506_v20 = vsel %vm1319_vm3, %v1317_v18, 0.0 }
 0x23b   :  { %v1500_v15 = vsel %vm1319_vm3, %v1315_v39, 0.0  ;;  %v1316_v17 = vmul.f32 %v2303_v16, %v1246_v14 }
 0x23c   :  { %1501 = vadd.xlane.f32.xlu0 %v1500_v15  ;;  %v1509_v21 = vsel %vm1319_vm3, %v1318_v11, 0.0 }
 0x23d   :  { %v1503_v19 = vsel %vm1319_vm3, %v1316_v17, 0.0 }
 0x23e   :  { %1504 = vadd.xlane.f32.xlu1 %v1503_v19 }
 0x240   :  { %1507 = vadd.xlane.f32.xlu0 %v1506_v20 }
 0x242   :  { %1510 = vadd.xlane.f32.xlu1 %v1509_v21 }
 0x250   :  { %v1328_v23 = vpop.xlane.xlu1 %1327 }
 0x251   :  { %v1520_v24 = vadd.f32 %v2498_v22, %v1328_v23  ;;  %v1322_v25 = vpop.xlane.xlu0 %1321 }
 0x252   :  { %v1518_v26 = vadd.f32 %v2498_v22, %v1322_v25 }
 0x253   :  { %1585 = vst.msk [vmem:[%s2827_s7 + $0x10] sm:$0xff] %vm1582_vm4, %v1520_v24 }
 0x254   :  { %1583 = vst.msk [vmem:[%s2827_s7] sm:$0xff] %vm1582_vm4, %v1518_v26  ;;  %v1331_v16 = vpop.xlane.xlu1 %1330 }
 0x255   :  { %v1521_v27 = vadd.f32 %v2498_v22, %v1331_v16  ;;  %v1325_v28 = vpop.xlane.xlu0 %1324 }
 0x256   :  { %v1519_v29 = vadd.f32 %v2498_v22, %v1325_v28 }
 0x257   :  { %1586 = vst.msk [vmem:[%s2827_s7 + $0x18] sm:$0xff] %vm1582_vm4, %v1521_v27 }
 0x258   :  { %1584 = vst.msk [vmem:[%s2827_s7 + $0x8] sm:$0xff] %vm1582_vm4, %v1519_v29 }
 0x259   :  { %v1340_v30 = vpop.xlane.xlu0 %1339 }
 0x25a   :  { %v1524_v31 = vadd.f32 %v2498_v22, %v1340_v30  ;;  %v1343_v32 = vpop.xlane.xlu1 %1342 }
 0x25b   :  { %v1525_v33 = vadd.f32 %v2498_v22, %v1343_v32 }
 0x25c   :  { %1589 = vst.msk [vmem:[%s2827_s7 + $0x30] sm:$0xff] %vm1582_vm4, %v1524_v31 }
 0x25d   :  { %1590 = vst.msk [vmem:[%s2827_s7 + $0x38] sm:$0xff] %vm1582_vm4, %v1525_v33  ;;  %v1334_v34 = vpop.xlane.xlu0 %1333 }
 0x25e   :  { %v1522_v35 = vadd.f32 %v2498_v22, %v1334_v34  ;;  %v1337_v36 = vpop.xlane.xlu1 %1336 }
 0x25f   :  { %v1523_v37 = vadd.f32 %v2498_v22, %v1337_v36 }
 0x260   :  { %1587 = vst.msk [vmem:[%s2827_s7 + $0x20] sm:$0xff] %vm1582_vm4, %v1522_v35 }
 0x261   :  { %1588 = vst.msk [vmem:[%s2827_s7 + $0x28] sm:$0xff] %vm1582_vm4, %v1523_v37  ;;  %v1352_v38 = vpop.xlane.xlu0 %1351 }
 0x262   :  { %v1528_v40 = vadd.f32 %v2498_v22, %v1352_v38  ;;  %v1355_v41 = vpop.xlane.xlu1 %1354 }
 0x263   :  { %v1529_v42 = vadd.f32 %v2498_v22, %v1355_v41 }
 0x264   :  { %1593 = vst.msk [vmem:[%s2827_s7 + $0x50] sm:$0xff] %vm1582_vm4, %v1528_v40 }
 0x265   :  { %1594 = vst.msk [vmem:[%s2827_s7 + $0x58] sm:$0xff] %vm1582_vm4, %v1529_v42  ;;  %v1346_v43 = vpop.xlane.xlu0 %1345 }
 0x266   :  { %v1526_v44 = vadd.f32 %v2498_v22, %v1346_v43  ;;  %v1349_v45 = vpop.xlane.xlu1 %1348 }
 0x267   :  { %v1527_v46 = vadd.f32 %v2498_v22, %v1349_v45 }
 0x268   :  { %1591 = vst.msk [vmem:[%s2827_s7 + $0x40] sm:$0xff] %vm1582_vm4, %v1526_v44 }
 0x269   :  { %1592 = vst.msk [vmem:[%s2827_s7 + $0x48] sm:$0xff] %vm1582_vm4, %v1527_v46  ;;  %v1364_v47 = vpop.xlane.xlu0 %1363 }
 0x26a   :  { %v1532_v48 = vadd.f32 %v2498_v22, %v1364_v47  ;;  %v1367_v49 = vpop.xlane.xlu1 %1366 }
 0x26b   :  { %v1533_v50 = vadd.f32 %v2498_v22, %v1367_v49 }
 0x26c   :  { %1597 = vst.msk [vmem:[%s2827_s7 + $0x70] sm:$0xff] %vm1582_vm4, %v1532_v48 }
 0x26d   :  { %1598 = vst.msk [vmem:[%s2827_s7 + $0x78] sm:$0xff] %vm1582_vm4, %v1533_v50  ;;  %v1358_v51 = vpop.xlane.xlu0 %1357 }
 0x26e   :  { %v1530_v52 = vadd.f32 %v2498_v22, %v1358_v51  ;;  %v1361_v53 = vpop.xlane.xlu1 %1360 }
 0x26f   :  { %v1531_v54 = vadd.f32 %v2498_v22, %v1361_v53 }
 0x270   :  { %1595 = vst.msk [vmem:[%s2827_s7 + $0x60] sm:$0xff] %vm1582_vm4, %v1530_v52 }
 0x271   :  { %1596 = vst.msk [vmem:[%s2827_s7 + $0x68] sm:$0xff] %vm1582_vm4, %v1531_v54  ;;  %v1376_v55 = vpop.xlane.xlu0 %1375 }
 0x272   :  { %v1536_v56 = vadd.f32 %v2498_v22, %v1376_v55  ;;  %v1379_v57 = vpop.xlane.xlu1 %1378 }
 0x273   :  { %v1537_v58 = vadd.f32 %v2498_v22, %v1379_v57 }
 0x274   :  { %1601 = vst.msk [vmem:[%s2827_s7 + $0x90] sm:$0xff] %vm1582_vm4, %v1536_v56 }
 0x275   :  { %1602 = vst.msk [vmem:[%s2827_s7 + $0x98] sm:$0xff] %vm1582_vm4, %v1537_v58  ;;  %v1370_v59 = vpop.xlane.xlu0 %1369 }
 0x276   :  { %v1534_v60 = vadd.f32 %v2498_v22, %v1370_v59  ;;  %v1373_v61 = vpop.xlane.xlu1 %1372 }
 0x277   :  { %v1535_v62 = vadd.f32 %v2498_v22, %v1373_v61 }
 0x278   :  { %1599 = vst.msk [vmem:[%s2827_s7 + $0x80] sm:$0xff] %vm1582_vm4, %v1534_v60 }
 0x279   :  { %1600 = vst.msk [vmem:[%s2827_s7 + $0x88] sm:$0xff] %vm1582_vm4, %v1535_v62  ;;  %v1388_v63 = vpop.xlane.xlu0 %1387 }
 0x27a   :  { %v1540_v0 = vadd.f32 %v2498_v22, %v1388_v63  ;;  %v1391_v1 = vpop.xlane.xlu1 %1390 }
 0x27b   :  { %v1541_v2 = vadd.f32 %v2498_v22, %v1391_v1 }
 0x27c   :  { %1605 = vst.msk [vmem:[%s2827_s7 + $0xb0] sm:$0xff] %vm1582_vm4, %v1540_v0 }
 0x27d   :  { %1606 = vst.msk [vmem:[%s2827_s7 + $0xb8] sm:$0xff] %vm1582_vm4, %v1541_v2  ;;  %v1382_v3 = vpop.xlane.xlu0 %1381 }
 0x27e   :  { %v1538_v4 = vadd.f32 %v2498_v22, %v1382_v3  ;;  %v1385_v5 = vpop.xlane.xlu1 %1384 }
 0x27f   :  { %v1539_v6 = vadd.f32 %v2498_v22, %v1385_v5 }
 0x280   :  { %1603 = vst.msk [vmem:[%s2827_s7 + $0xa0] sm:$0xff] %vm1582_vm4, %v1538_v4 }
 0x281   :  { %1604 = vst.msk [vmem:[%s2827_s7 + $0xa8] sm:$0xff] %vm1582_vm4, %v1539_v6  ;;  %v1400_v7 = vpop.xlane.xlu0 %1399 }
 0x282   :  { %v1544_v8 = vadd.f32 %v2498_v22, %v1400_v7  ;;  %v1403_v9 = vpop.xlane.xlu1 %1402 }
 0x283   :  { %v1545_v10 = vadd.f32 %v2498_v22, %v1403_v9 }
 0x284   :  { %1609 = vst.msk [vmem:[%s2827_s7 + $0xd0] sm:$0xff] %vm1582_vm4, %v1544_v8 }
 0x285   :  { %1610 = vst.msk [vmem:[%s2827_s7 + $0xd8] sm:$0xff] %vm1582_vm4, %v1545_v10  ;;  %v1394_v12 = vpop.xlane.xlu0 %1393 }
 0x286   :  { %v1542_v13 = vadd.f32 %v2498_v22, %v1394_v12  ;;  %v1397_v14 = vpop.xlane.xlu1 %1396 }
 0x287   :  { %v1543_v39 = vadd.f32 %v2498_v22, %v1397_v14 }
 0x288   :  { %1607 = vst.msk [vmem:[%s2827_s7 + $0xc0] sm:$0xff] %vm1582_vm4, %v1542_v13 }
 0x289   :  { %1608 = vst.msk [vmem:[%s2827_s7 + $0xc8] sm:$0xff] %vm1582_vm4, %v1543_v39  ;;  %v1412_v15 = vpop.xlane.xlu0 %1411 }
 0x28a   :  { %v1548_v17 = vadd.f32 %v2498_v22, %v1412_v15  ;;  %v1415_v18 = vpop.xlane.xlu1 %1414 }
 0x28b   :  { %v1549_v19 = vadd.f32 %v2498_v22, %v1415_v18 }
 0x28c   :  { %1613 = vst.msk [vmem:[%s2827_s7 + $0xf0] sm:$0xff] %vm1582_vm4, %v1548_v17 }
 0x28d   :  { %1614 = vst.msk [vmem:[%s2827_s7 + $0xf8] sm:$0xff] %vm1582_vm4, %v1549_v19  ;;  %v1406_v11 = vpop.xlane.xlu0 %1405 }
 0x28e   :  { %v1546_v20 = vadd.f32 %v2498_v22, %v1406_v11  ;;  %v1409_v21 = vpop.xlane.xlu1 %1408 }
 0x28f   :  { %v1547_v23 = vadd.f32 %v2498_v22, %v1409_v21 }
 0x290   :  { %1611 = vst.msk [vmem:[%s2827_s7 + $0xe0] sm:$0xff] %vm1582_vm4, %v1546_v20 }
 0x291   :  { %1612 = vst.msk [vmem:[%s2827_s7 + $0xe8] sm:$0xff] %vm1582_vm4, %v1547_v23  ;;  %v1424_v24 = vpop.xlane.xlu0 %1423 }
 0x292   :  { %v1552_v25 = vadd.f32 %v2498_v22, %v1424_v24  ;;  %v1427_v26 = vpop.xlane.xlu1 %1426 }
 0x293   :  { %v1553_v16 = vadd.f32 %v2498_v22, %v1427_v26 }
 0x294   :  { %1617 = vst.msk [vmem:[%s2827_s7 + $0x110] sm:$0xff] %vm1582_vm4, %v1552_v25 }
 0x295   :  { %1618 = vst.msk [vmem:[%s2827_s7 + $0x118] sm:$0xff] %vm1582_vm4, %v1553_v16  ;;  %v1418_v27 = vpop.xlane.xlu0 %1417 }
 0x296   :  { %v1550_v28 = vadd.f32 %v2498_v22, %v1418_v27  ;;  %v1421_v29 = vpop.xlane.xlu1 %1420 }
 0x297   :  { %v1551_v30 = vadd.f32 %v2498_v22, %v1421_v29 }
 0x298   :  { %1615 = vst.msk [vmem:[%s2827_s7 + $0x100] sm:$0xff] %vm1582_vm4, %v1550_v28 }
 0x299   :  { %1616 = vst.msk [vmem:[%s2827_s7 + $0x108] sm:$0xff] %vm1582_vm4, %v1551_v30  ;;  %v1436_v31 = vpop.xlane.xlu0 %1435 }
 0x29a   :  { %v1556_v32 = vadd.f32 %v2498_v22, %v1436_v31  ;;  %v1439_v33 = vpop.xlane.xlu1 %1438 }
 0x29b   :  { %v1557_v34 = vadd.f32 %v2498_v22, %v1439_v33 }
 0x29c   :  { %1621 = vst.msk [vmem:[%s2827_s7 + $0x130] sm:$0xff] %vm1582_vm4, %v1556_v32 }
 0x29d   :  { %1622 = vst.msk [vmem:[%s2827_s7 + $0x138] sm:$0xff] %vm1582_vm4, %v1557_v34  ;;  %v1430_v35 = vpop.xlane.xlu0 %1429 }
 0x29e   :  { %v1554_v36 = vadd.f32 %v2498_v22, %v1430_v35  ;;  %v1433_v37 = vpop.xlane.xlu1 %1432 }
 0x29f   :  { %v1555_v38 = vadd.f32 %v2498_v22, %v1433_v37 }
 0x2a0   :  { %1619 = vst.msk [vmem:[%s2827_s7 + $0x120] sm:$0xff] %vm1582_vm4, %v1554_v36 }
 0x2a1   :  { %1620 = vst.msk [vmem:[%s2827_s7 + $0x128] sm:$0xff] %vm1582_vm4, %v1555_v38  ;;  %v1448_v40 = vpop.xlane.xlu0 %1447 }
 0x2a2   :  { %v1560_v41 = vadd.f32 %v2498_v22, %v1448_v40  ;;  %v1451_v42 = vpop.xlane.xlu1 %1450 }
 0x2a3   :  { %v1561_v43 = vadd.f32 %v2498_v22, %v1451_v42 }
 0x2a4   :  { %1625 = vst.msk [vmem:[%s2827_s7 + $0x150] sm:$0xff] %vm1582_vm4, %v1560_v41 }
 0x2a5   :  { %1626 = vst.msk [vmem:[%s2827_s7 + $0x158] sm:$0xff] %vm1582_vm4, %v1561_v43  ;;  %v1442_v44 = vpop.xlane.xlu0 %1441 }
 0x2a6   :  { %v1558_v45 = vadd.f32 %v2498_v22, %v1442_v44  ;;  %v1445_v46 = vpop.xlane.xlu1 %1444 }
 0x2a7   :  { %v1559_v47 = vadd.f32 %v2498_v22, %v1445_v46 }
 0x2a8   :  { %1623 = vst.msk [vmem:[%s2827_s7 + $0x140] sm:$0xff] %vm1582_vm4, %v1558_v45 }
 0x2a9   :  { %1624 = vst.msk [vmem:[%s2827_s7 + $0x148] sm:$0xff] %vm1582_vm4, %v1559_v47  ;;  %v1460_v48 = vpop.xlane.xlu0 %1459 }
 0x2aa   :  { %v1564_v49 = vadd.f32 %v2498_v22, %v1460_v48  ;;  %v1463_v50 = vpop.xlane.xlu1 %1462 }
 0x2ab   :  { %v1565_v51 = vadd.f32 %v2498_v22, %v1463_v50 }
 0x2ac   :  { %1629 = vst.msk [vmem:[%s2827_s7 + $0x170] sm:$0xff] %vm1582_vm4, %v1564_v49 }
 0x2ad   :  { %1630 = vst.msk [vmem:[%s2827_s7 + $0x178] sm:$0xff] %vm1582_vm4, %v1565_v51  ;;  %v1454_v52 = vpop.xlane.xlu0 %1453 }
 0x2ae   :  { %v1562_v53 = vadd.f32 %v2498_v22, %v1454_v52  ;;  %v1457_v54 = vpop.xlane.xlu1 %1456 }
 0x2af   :  { %v1563_v55 = vadd.f32 %v2498_v22, %v1457_v54 }
 0x2b0   :  { %1627 = vst.msk [vmem:[%s2827_s7 + $0x160] sm:$0xff] %vm1582_vm4, %v1562_v53 }
 0x2b1   :  { %1628 = vst.msk [vmem:[%s2827_s7 + $0x168] sm:$0xff] %vm1582_vm4, %v1563_v55  ;;  %v1472_v56 = vpop.xlane.xlu0 %1471 }
 0x2b2   :  { %v1568_v57 = vadd.f32 %v2498_v22, %v1472_v56  ;;  %v1475_v58 = vpop.xlane.xlu1 %1474 }
 0x2b3   :  { %v1569_v59 = vadd.f32 %v2498_v22, %v1475_v58 }
 0x2b4   :  { %1633 = vst.msk [vmem:[%s2827_s7 + $0x190] sm:$0xff] %vm1582_vm4, %v1568_v57 }
 0x2b5   :  { %1634 = vst.msk [vmem:[%s2827_s7 + $0x198] sm:$0xff] %vm1582_vm4, %v1569_v59  ;;  %v1466_v60 = vpop.xlane.xlu0 %1465 }
 0x2b6   :  { %v1566_v61 = vadd.f32 %v2498_v22, %v1466_v60  ;;  %v1469_v62 = vpop.xlane.xlu1 %1468 }
 0x2b7   :  { %v1567_v63 = vadd.f32 %v2498_v22, %v1469_v62 }
 0x2b8   :  { %1631 = vst.msk [vmem:[%s2827_s7 + $0x180] sm:$0xff] %vm1582_vm4, %v1566_v61 }
 0x2b9   :  { %1632 = vst.msk [vmem:[%s2827_s7 + $0x188] sm:$0xff] %vm1582_vm4, %v1567_v63  ;;  %v1484_v0 = vpop.xlane.xlu0 %1483 }
 0x2ba   :  { %v1572_v1 = vadd.f32 %v2498_v22, %v1484_v0  ;;  %v1487_v2 = vpop.xlane.xlu1 %1486 }
 0x2bb   :  { %v1573_v3 = vadd.f32 %v2498_v22, %v1487_v2 }
 0x2bc   :  { %1637 = vst.msk [vmem:[%s2827_s7 + $0x1b0] sm:$0xff] %vm1582_vm4, %v1572_v1 }
 0x2bd   :  { %1638 = vst.msk [vmem:[%s2827_s7 + $0x1b8] sm:$0xff] %vm1582_vm4, %v1573_v3  ;;  %v1478_v4 = vpop.xlane.xlu0 %1477 }
 0x2be   :  { %v1570_v5 = vadd.f32 %v2498_v22, %v1478_v4  ;;  %v1481_v6 = vpop.xlane.xlu1 %1480 }
 0x2bf   :  { %v1571_v7 = vadd.f32 %v2498_v22, %v1481_v6 }
 0x2c0   :  { %1635 = vst.msk [vmem:[%s2827_s7 + $0x1a0] sm:$0xff] %vm1582_vm4, %v1570_v5 }
 0x2c1   :  { %1636 = vst.msk [vmem:[%s2827_s7 + $0x1a8] sm:$0xff] %vm1582_vm4, %v1571_v7  ;;  %v1496_v8 = vpop.xlane.xlu0 %1495 }
 0x2c2   :  { %v1576_v9 = vadd.f32 %v2498_v22, %v1496_v8  ;;  %v1499_v10 = vpop.xlane.xlu1 %1498 }
 0x2c3   :  { %v1577_v12 = vadd.f32 %v2498_v22, %v1499_v10 }
 0x2c4   :  { %1641 = vst.msk [vmem:[%s2827_s7 + $0x1d0] sm:$0xff] %vm1582_vm4, %v1576_v9 }
 0x2c5   :  { %1642 = vst.msk [vmem:[%s2827_s7 + $0x1d8] sm:$0xff] %vm1582_vm4, %v1577_v12  ;;  %v1490_v13 = vpop.xlane.xlu0 %1489 }
 0x2c6   :  { %v1574_v14 = vadd.f32 %v2498_v22, %v1490_v13  ;;  %v1493_v39 = vpop.xlane.xlu1 %1492 }
 0x2c7   :  { %v1575_v15 = vadd.f32 %v2498_v22, %v1493_v39 }
 0x2c8   :  { %1639 = vst.msk [vmem:[%s2827_s7 + $0x1c0] sm:$0xff] %vm1582_vm4, %v1574_v14 }
 0x2c9   :  { %1640 = vst.msk [vmem:[%s2827_s7 + $0x1c8] sm:$0xff] %vm1582_vm4, %v1575_v15  ;;  %v1502_v17 = vpop.xlane.xlu0 %1501 }
 0x2ca   :  { %v1578_v18 = vadd.f32 %v2498_v22, %v1502_v17 }
 0x2cb   :  { %v1505_v19 = vpop.xlane.xlu1 %1504 }
 0x2cc   :  { %1643 = vst.msk [vmem:[%s2827_s7 + $0x1e0] sm:$0xff] %vm1582_vm4, %v1578_v18  ;;  %v1579_v11 = vadd.f32 %v2498_v22, %v1505_v19 }
 0x2cd   :  { %v1508_v20 = vpop.xlane.xlu0 %1507 }
 0x2ce   :  { %1644 = vst.msk [vmem:[%s2827_s7 + $0x1e8] sm:$0xff] %vm1582_vm4, %v1579_v11  ;;  %v1580_v21 = vadd.f32 %v2498_v22, %v1508_v20 }
 0x2cf   :  { %v1511_v23 = vpop.xlane.xlu1 %1510 }
 0x2d0   :  { %1645 = vst.msk [vmem:[%s2827_s7 + $0x1f0] sm:$0xff] %vm1582_vm4, %v1580_v21  ;;  %v1581_v24 = vadd.f32 %v2498_v22, %v1511_v23 }
 0x2d2   :  { %1646 = vst.msk [vmem:[%s2827_s7 + $0x1f8] sm:$0xff] %vm1582_vm4, %v1581_v24 }

</bundles_post_ra>
